<compile_context>
chip_gen: v5e
topology: v5e:2x2
jax: 0.10.0
libtpu: 0.0.40
codegen_flags: <defaults>
</compile_context>

<pallas_src>
import jax
import jax.numpy as jnp
import numpy as np
from jax import lax
from jax.experimental import pallas as pl
from jax.experimental.pallas import tpu as pltpu

# Model hyper-parameters (OriginalTCNModel(input_size=4, output_size=1,
#                                           num_channels=32, kernel_size=3))
INPUT_SIZE = 4
OUTPUT_SIZE = 1
NUM_CHANNELS = 32      # -> TCN(num_channels=[32]*8)
KERNEL_SIZE = 3
NUM_BLOCKS = 8         # dilations 1, 2, 4, ..., 128
BATCH = 2
SEQ_LEN = 16

_KC = KERNEL_SIZE * NUM_CHANNELS            # 96 rows per conv-weight block
_W2_OFF = NUM_BLOCKS * _KC                  # 768: start of conv2 weights
_WD_OFF = 2 * NUM_BLOCKS * _KC              # 1536: start of 1x1 downsample
_W_ROWS = _WD_OFF + NUM_CHANNELS            # 1568 total bf16 weight rows
_P_ROWS = 2 * NUM_BLOCKS + 3                # 19 f32 param rows


def tcn_forward_kernel(x_ref, w_ref, p_ref, out_ref, slab_ref):
    """Whole batch + whole model in one invocation.

    x_ref   : (B*L, C) f32   — batch stacked along the sublane (time) axis.
    w_ref   : (1568, C) bf16 — [w1 blocks | w2 blocks | 1x1 downsample], each
                               conv block packed as (tap, C_in) on the rows.
    p_ref   : (19, C)  f32   — [b1 (8) | b2 (8) | bd | wl^T | bl in lane 0].
    out_ref : (B, O)   f32
    slab_ref: (B*L, K*C) bf16 VMEM scratch — packed conv contraction slab.
    """
    B, L, C, K, NB = BATCH, SEQ_LEN, NUM_CHANNELS, KERNEL_SIZE, NUM_BLOCKS

    # Hoisted once: row-within-sample index and one boolean mask per distinct
    # causal shift used by any block (JAX does not CSE broadcast/iota, so build
    # them a single time and reuse across all 16 convs).
    row_t = lax.broadcasted_iota(jnp.int32, (B * L, C), 0) % L
    shifts_used = sorted({(K - 1 - j) * (2 ** blk)
                          for blk in range(NB) for j in range(K)
                          if 0 < (K - 1 - j) * (2 ** blk) < L})
    shift_masks = {s: row_t >= s for s in shifts_used}

    def shifted_tap(h, s):
        # row (b*L + t) <- h[b*L + t - s] if t >= s else 0 (causal left pad).
        if s == 0:
            return h
        rolled = pltpu.roll(h, shift=s, axis=0)          # XLU sublane rotate
        return jnp.where(shift_masks[s], rolled, 0.0)    # zero wrapped rows

    def dilated_causal_conv(h, w_off, bias, d):
        # Live taps have shift (K-1-j)*d < L; dead taps only ever read the
        # causal zero padding and are dropped at trace time.  Dead taps are
        # always the leading ones, so live weights are a contiguous tail.
        live = [(K - 1 - j) * d for j in range(K) if (K - 1 - j) * d < L]
        n_live = len(live)
        first_live = K - n_live
        w_live = w_ref[w_off + first_live * C: w_off + K * C, :]   # bf16
        if n_live == 1:
            slab = h.astype(jnp.bfloat16)                # degenerate 1x1 conv
        else:
            # Pack taps into the contraction dim via bf16 lane-slice stores
            # into the scratch slab (vst slot), not jnp.concatenate.
            for i, s in enumerate(live):
                slab_ref[:, i * C:(i + 1) * C] = (
                    shifted_tap(h, s).astype(jnp.bfloat16))
            slab = slab_ref[:, : n_live * C]
        acc = jnp.dot(slab, w_live, preferred_element_type=jnp.float32)
        return acc + bias                                 # bias add in f32

    h = x_ref[...]                                        # (B*L, C) f32
    skip_sum = None
    for blk in range(NB):
        d = 2 ** blk
        b1 = p_ref[blk: blk + 1, :]
        b2 = p_ref[NB + blk: NB + blk + 1, :]
        # conv1 -> ReLU (-> Dropout: identity at inference)
        o = jnp.maximum(dilated_causal_conv(h, blk * _KC, b1, d), 0.0)
        # conv2 -> ReLU (-> Dropout: identity at inference)
        o = jnp.maximum(dilated_causal_conv(o, _W2_OFF + blk * _KC, b2, d), 0.0)
        # residual path (1x1 downsample only on block 0: C_in != C_out)
        if blk == 0:
            res = jnp.dot(h.astype(jnp.bfloat16),
                          w_ref[_WD_OFF:_WD_OFF + C, :],
                          preferred_element_type=jnp.float32)
            res = res + p_ref[2 * NB: 2 * NB + 1, :]
        else:
            res = h
        # use_skip_connections=True: collect pre-residual block outputs
        skip_sum = o if skip_sum is None else skip_sum + o
        h = jnp.maximum(o + res, 0.0)

    # Final Linear on the last timestep of each sample, done on VPU + XLU
    # (avoids a 1-lane-wide MXU dot at the very end of the serial chain).
    wl_row = p_ref[2 * NB + 1: 2 * NB + 2, :]             # (1, C) f32
    bl = p_ref[2 * NB + 2: 2 * NB + 3, 0:OUTPUT_SIZE]     # (1, O) f32
    red = jnp.sum(skip_sum * wl_row, axis=-1, keepdims=True)   # (B*L, 1)
    for b in range(B):
        out_ref[b:b + 1, :] = red[(b + 1) * L - 1: (b + 1) * L, :] + bl


def init_params(key):
    """Deterministic synthetic parameters (weight_norm folded to plain weights).

    Conv weights use layout (block, tap, C_in, C_out).
    # TODO(synk): real PyTorch Conv1d checkpoints are (C_out, C_in, K) with
    # weight_norm (g, v); transpose/fold when loading real weights.
    """
    C, K, NB, O = NUM_CHANNELS, KERNEL_SIZE, NUM_BLOCKS, OUTPUT_SIZE
    ks = jax.random.split(key, 8)
    s = 0.1
    w1 = s * jax.random.normal(ks[0], (NB, K, C, C), jnp.float32)
    b1 = s * jax.random.normal(ks[1], (NB, 1, C), jnp.float32)
    w2 = s * jax.random.normal(ks[2], (NB, K, C, C), jnp.float32)
    b2 = s * jax.random.normal(ks[3], (NB, 1, C), jnp.float32)
    wd = s * jax.random.normal(ks[4], (C, C), jnp.float32)       # 1x1 downsample
    bd = s * jax.random.normal(ks[5], (1, C), jnp.float32)
    wl = s * jax.random.normal(ks[6], (C, O), jnp.float32)       # nn.Linear (C->O)
    bl = s * jax.random.normal(ks[7], (1, O), jnp.float32)
    return (w1, b1, w2, b2, wd, bd, wl, bl)


def pack_operands(x, params):
    """Host-side packing into 3 kernel operands (x, bf16 weight slab, f32 param slab)."""
    w1, b1, w2, b2, wd, bd, wl, bl = params
    C, K, NB = NUM_CHANNELS, KERNEL_SIZE, NUM_BLOCKS
    N, L, f_in = x.shape

    # Zero-pad features to C and stack the batch along the sublane (time) axis.
    x_pad = jnp.pad(x.astype(jnp.float32), ((0, 0), (0, 0), (0, C - f_in)))
    x_stacked = x_pad.reshape(N * L, C)

    # bf16 weight slab: [w1 (NB*K*C rows) | w2 (NB*K*C rows) | wd (C rows)].
    w_slab = jnp.concatenate(
        [w1.reshape(NB * K * C, C), w2.reshape(NB * K * C, C), wd],
        axis=0).astype(jnp.bfloat16)                       # (1568, 32)

    # f32 param slab: [b1 (8 rows) | b2 (8 rows) | bd | wl^T | bl in lane 0].
    bl_row = jnp.pad(bl, ((0, 0), (0, C - OUTPUT_SIZE)))
    p_slab = jnp.concatenate(
        [b1.reshape(NB, C), b2.reshape(NB, C), bd, wl.T, bl_row],
        axis=0).astype(jnp.float32)                        # (19, 32)
    return x_stacked, w_slab, p_slab, x_pad


@jax.jit
def original_tcn_model_forward(x, params):
    """x: (BATCH, SEQ_LEN, INPUT_SIZE) -> (BATCH, OUTPUT_SIZE)."""
    x_stacked, w_slab, p_slab, x_pad = pack_operands(x, params)
    # Single grid-less invocation; total VMEM footprint << 1 MiB, so no
    # tiling / pipelining / vmem tuning is needed on any TPU generation.
    out = pl.pallas_call(
        tcn_forward_kernel,
        out_shape=jax.ShapeDtypeStruct((x.shape[0], OUTPUT_SIZE), jnp.float32),
        in_specs=[pl.BlockSpec(memory_space=pltpu.MemorySpace.VMEM)] * 3,
        out_specs=pl.BlockSpec(memory_space=pltpu.MemorySpace.VMEM),
        scratch_shapes=[pltpu.VMEM(
            (BATCH * SEQ_LEN, KERNEL_SIZE * NUM_CHANNELS), jnp.bfloat16)],
    )(x_stacked, w_slab, p_slab)
    return out, x_pad


def tcn_reference(x_pad, params):
    """Pure-JAX reference with the same numerics as the kernel
    (bf16 MXU operands, f32 accumulation, f32 element-wise math)."""
    w1, b1, w2, b2, wd, bd, wl, bl = params
    N, L, C = x_pad.shape
    NB, K = w1.shape[0], w1.shape[1]

    def shift(h, s):
        if s == 0:
            return h
        if s >= L:
            return jnp.zeros_like(h)
        return jnp.concatenate(
            [jnp.zeros((N, s, C), h.dtype), h[:, :L - s, :]], axis=1)

    def conv(h, w, b, d):
        acc = jnp.zeros((N, L, C), jnp.float32)
        for j in range(K):
            s = (K - 1 - j) * d
            acc = acc + jnp.einsum(
                'nlc,co->nlo',
                shift(h, s).astype(jnp.bfloat16), w[j].astype(jnp.bfloat16),
                preferred_element_type=jnp.float32)
        return acc + b[None]

    h = x_pad
    skip = jnp.zeros((N, L, C), jnp.float32)
    for blk in range(NB):
        d = 2 ** blk
        o = jax.nn.relu(conv(h, w1[blk], b1[blk], d))
        o = jax.nn.relu(conv(o, w2[blk], b2[blk], d))
        if blk == 0:
            res = jnp.einsum('nlc,co->nlo',
                             h.astype(jnp.bfloat16), wd.astype(jnp.bfloat16),
                             preferred_element_type=jnp.float32) + bd[None]
        else:
            res = h
        skip = skip + o
        h = jax.nn.relu(o + res)
    y_last = skip[:, -1, :]
    return y_last @ wl + bl


if __name__ == "__main__":
    key = jax.random.PRNGKey(0)
    kx, kp = jax.random.split(key)
    x = jax.random.normal(kx, (BATCH, SEQ_LEN, INPUT_SIZE), jnp.float32)
    params = init_params(kp)

    out, x_pad = original_tcn_model_forward(x, params)
    out = jax.block_until_ready(out)

    ref = tcn_reference(x_pad, params)
    if not np.allclose(np.asarray(out), np.asarray(ref), rtol=1e-3, atol=1e-3):
        raise AssertionError(
            f"Pallas kernel mismatch vs reference:\n{out}\nvs\n{ref}")
    print("KERNEL_OK")
</pallas_src>

<mosaic_0001>
module attributes {stable_mosaic.version = 11 : i64} {
  func.func @tcn_forward_kernel(%arg0: memref<32x32xf32, #tpu.memory_space<vmem>>, %arg1: memref<1568x32xbf16, #tpu.memory_space<vmem>>, %arg2: memref<19x32xf32, #tpu.memory_space<vmem>>, %arg3: memref<2x1xf32, #tpu.memory_space<vmem>>, %arg4: memref<32x96xbf16, #tpu.memory_space<vmem>>) attributes {dimension_semantics = [], scalar_prefetch = 0 : i64, scratch_operands = 1 : i64, tpu.core_type = #tpu.core_type<tc>} {
    %0 = tpu.iota {dimensions = array<i32: 0>} : vector<32x32xi32>
    %c16_i32 = arith.constant 16 : i32
    %c0_i32 = arith.constant 0 : i32
    %1 = arith.cmpi eq, %c16_i32, %c0_i32 : i32
    %c1_i32 = arith.constant 1 : i32
    %2 = arith.select %1, %c1_i32, %c16_i32 : i32
    %3 = vector.broadcast %2 : i32 to vector<32x32xi32>
    %4 = arith.remsi %0, %3 : vector<32x32xi32>
    %c0_i32_0 = arith.constant 0 : i32
    %5 = vector.broadcast %c0_i32_0 : i32 to vector<32x32xi32>
    %6 = arith.cmpi ne, %4, %5 : vector<32x32xi32>
    %c0_i32_1 = arith.constant 0 : i32
    %7 = vector.broadcast %c0_i32_1 : i32 to vector<32x32xi32>
    %8 = arith.cmpi slt, %4, %7 : vector<32x32xi32>
    %c0_i32_2 = arith.constant 0 : i32
    %9 = arith.cmpi slt, %2, %c0_i32_2 : i32
    %10 = vector.broadcast %9 : i1 to vector<32x32xi1>
    %11 = vector.broadcast %10 : vector<32x32xi1> to vector<32x32xi1>
    %12 = arith.xori %8, %11 : vector<32x32xi1>
    %13 = arith.andi %12, %6 : vector<32x32xi1>
    %14 = vector.broadcast %2 : i32 to vector<32x32xi32>
    %15 = arith.addi %4, %14 : vector<32x32xi32>
    %16 = arith.select %13, %15, %4 : vector<32x32xi1>, vector<32x32xi32>
    %c1_i32_3 = arith.constant 1 : i32
    %17 = vector.broadcast %c1_i32_3 : i32 to vector<32x32xi32>
    %18 = arith.cmpi sge, %16, %17 : vector<32x32xi32>
    %c2_i32 = arith.constant 2 : i32
    %19 = vector.broadcast %c2_i32 : i32 to vector<32x32xi32>
    %20 = arith.cmpi sge, %16, %19 : vector<32x32xi32>
    %c4_i32 = arith.constant 4 : i32
    %21 = vector.broadcast %c4_i32 : i32 to vector<32x32xi32>
    %22 = arith.cmpi sge, %16, %21 : vector<32x32xi32>
    %c8_i32 = arith.constant 8 : i32
    %23 = vector.broadcast %c8_i32 : i32 to vector<32x32xi32>
    %24 = arith.cmpi sge, %16, %23 : vector<32x32xi32>
    %c0 = arith.constant 0 : index
    %c0_4 = arith.constant 0 : index
    %25 = vector.load %arg0[%c0, %c0_4] : memref<32x32xf32, #tpu.memory_space<vmem>>, vector<32x32xf32>
    %c0_5 = arith.constant 0 : index
    %c0_6 = arith.constant 0 : index
    %26 = vector.load %arg2[%c0_5, %c0_6] : memref<19x32xf32, #tpu.memory_space<vmem>>, vector<1x32xf32>
    %c8 = arith.constant 8 : index
    %c0_7 = arith.constant 0 : index
    %27 = vector.load %arg2[%c8, %c0_7] : memref<19x32xf32, #tpu.memory_space<vmem>>, vector<1x32xf32>
    %c0_8 = arith.constant 0 : index
    %c0_9 = arith.constant 0 : index
    %28 = vector.load %arg1[%c0_8, %c0_9] : memref<1568x32xbf16, #tpu.memory_space<vmem>>, vector<96x32xbf16>
    %c2_i32_10 = arith.constant 2 : i32
    %29 = tpu.dynamic_rotate %25 by %c2_i32_10 dim 0 : vector<32x32xf32>, i32 -> vector<32x32xf32>
    %cst = arith.constant 0.000000e+00 : f32
    %30 = vector.broadcast %cst : f32 to vector<32x32xf32>
    %31 = arith.select %20, %29, %30 : vector<32x32xi1>, vector<32x32xf32>
    %32 = arith.truncf %31 : vector<32x32xf32> to vector<32x32xbf16>
    %c0_11 = arith.constant 0 : index
    %c0_12 = arith.constant 0 : index
    %33 = vector.load %arg4[%c0_11, %c0_12] : memref<32x96xbf16, #tpu.memory_space<vmem>>, vector<32x32xbf16>
    tpu.vector_store %arg4[%c0_11, %c0_12], %32 {strides = array<i32>} : memref<32x96xbf16, #tpu.memory_space<vmem>>, vector<32x32xbf16>,
    %c1_i32_13 = arith.constant 1 : i32
    %34 = tpu.dynamic_rotate %25 by %c1_i32_13 dim 0 : vector<32x32xf32>, i32 -> vector<32x32xf32>
    %cst_14 = arith.constant 0.000000e+00 : f32
    %35 = vector.broadcast %cst_14 : f32 to vector<32x32xf32>
    %36 = arith.select %18, %34, %35 : vector<32x32xi1>, vector<32x32xf32>
    %37 = arith.truncf %36 : vector<32x32xf32> to vector<32x32xbf16>
    %c0_15 = arith.constant 0 : index
    %c32 = arith.constant 32 : index
    %38 = vector.load %arg4[%c0_15, %c32] : memref<32x96xbf16, #tpu.memory_space<vmem>>, vector<32x32xbf16>
    tpu.vector_store %arg4[%c0_15, %c32], %37 {strides = array<i32>} : memref<32x96xbf16, #tpu.memory_space<vmem>>, vector<32x32xbf16>,
    %39 = arith.truncf %25 : vector<32x32xf32> to vector<32x32xbf16>
    %c0_16 = arith.constant 0 : index
    %c64 = arith.constant 64 : index
    %40 = vector.load %arg4[%c0_16, %c64] : memref<32x96xbf16, #tpu.memory_space<vmem>>, vector<32x32xbf16>
    tpu.vector_store %arg4[%c0_16, %c64], %39 {strides = array<i32>} : memref<32x96xbf16, #tpu.memory_space<vmem>>, vector<32x32xbf16>,
    %c0_17 = arith.constant 0 : index
    %c0_18 = arith.constant 0 : index
    %41 = vector.load %arg4[%c0_17, %c0_18] : memref<32x96xbf16, #tpu.memory_space<vmem>>, vector<32x96xbf16>
    %cst_19 = arith.constant dense<0.000000e+00> : vector<32x32xf32>
    %42 = tpu.matmul %41, %28, %cst_19 {dimension_numbers = #tpu.dot_dimension_numbers<[1], [0], [0], [1], [0, 0, 1, 1], [], []>} : vector<32x96xbf16>, vector<96x32xbf16>, vector<32x32xf32> -> vector<32x32xf32>
    %43 = vector.broadcast %26 : vector<1x32xf32> to vector<32x32xf32>
    %44 = arith.addf %42, %43 : vector<32x32xf32>
    %cst_20 = arith.constant 0.000000e+00 : f32
    %45 = vector.broadcast %cst_20 : f32 to vector<32x32xf32>
    %46 = arith.maximumf %44, %45 : vector<32x32xf32>
    %c768 = arith.constant 768 : index
    %c0_21 = arith.constant 0 : index
    %47 = vector.load %arg1[%c768, %c0_21] : memref<1568x32xbf16, #tpu.memory_space<vmem>>, vector<96x32xbf16>
    %c2_i32_22 = arith.constant 2 : i32
    %48 = tpu.dynamic_rotate %46 by %c2_i32_22 dim 0 : vector<32x32xf32>, i32 -> vector<32x32xf32>
    %cst_23 = arith.constant 0.000000e+00 : f32
    %49 = vector.broadcast %cst_23 : f32 to vector<32x32xf32>
    %50 = arith.select %20, %48, %49 : vector<32x32xi1>, vector<32x32xf32>
    %51 = arith.truncf %50 : vector<32x32xf32> to vector<32x32xbf16>
    %c0_24 = arith.constant 0 : index
    %c0_25 = arith.constant 0 : index
    %52 = vector.load %arg4[%c0_24, %c0_25] : memref<32x96xbf16, #tpu.memory_space<vmem>>, vector<32x32xbf16>
    tpu.vector_store %arg4[%c0_24, %c0_25], %51 {strides = array<i32>} : memref<32x96xbf16, #tpu.memory_space<vmem>>, vector<32x32xbf16>,
    %c1_i32_26 = arith.constant 1 : i32
    %53 = tpu.dynamic_rotate %46 by %c1_i32_26 dim 0 : vector<32x32xf32>, i32 -> vector<32x32xf32>
    %cst_27 = arith.constant 0.000000e+00 : f32
    %54 = vector.broadcast %cst_27 : f32 to vector<32x32xf32>
    %55 = arith.select %18, %53, %54 : vector<32x32xi1>, vector<32x32xf32>
    %56 = arith.truncf %55 : vector<32x32xf32> to vector<32x32xbf16>
    %c0_28 = arith.constant 0 : index
    %c32_29 = arith.constant 32 : index
    %57 = vector.load %arg4[%c0_28, %c32_29] : memref<32x96xbf16, #tpu.memory_space<vmem>>, vector<32x32xbf16>
    tpu.vector_store %arg4[%c0_28, %c32_29], %56 {strides = array<i32>} : memref<32x96xbf16, #tpu.memory_space<vmem>>, vector<32x32xbf16>,
    %58 = arith.truncf %46 : vector<32x32xf32> to vector<32x32xbf16>
    %c0_30 = arith.constant 0 : index
    %c64_31 = arith.constant 64 : index
    %59 = vector.load %arg4[%c0_30, %c64_31] : memref<32x96xbf16, #tpu.memory_space<vmem>>, vector<32x32xbf16>
    tpu.vector_store %arg4[%c0_30, %c64_31], %58 {strides = array<i32>} : memref<32x96xbf16, #tpu.memory_space<vmem>>, vector<32x32xbf16>,
    %c0_32 = arith.constant 0 : index
    %c0_33 = arith.constant 0 : index
    %60 = vector.load %arg4[%c0_32, %c0_33] : memref<32x96xbf16, #tpu.memory_space<vmem>>, vector<32x96xbf16>
    %cst_34 = arith.constant dense<0.000000e+00> : vector<32x32xf32>
    %61 = tpu.matmul %60, %47, %cst_34 {dimension_numbers = #tpu.dot_dimension_numbers<[1], [0], [0], [1], [0, 0, 1, 1], [], []>} : vector<32x96xbf16>, vector<96x32xbf16>, vector<32x32xf32> -> vector<32x32xf32>
    %62 = vector.broadcast %27 : vector<1x32xf32> to vector<32x32xf32>
    %63 = arith.addf %61, %62 : vector<32x32xf32>
    %cst_35 = arith.constant 0.000000e+00 : f32
    %64 = vector.broadcast %cst_35 : f32 to vector<32x32xf32>
    %65 = arith.maximumf %63, %64 : vector<32x32xf32>
    %66 = arith.truncf %25 : vector<32x32xf32> to vector<32x32xbf16>
    %c1536 = arith.constant 1536 : index
    %c0_36 = arith.constant 0 : index
    %67 = vector.load %arg1[%c1536, %c0_36] : memref<1568x32xbf16, #tpu.memory_space<vmem>>, vector<32x32xbf16>
    %cst_37 = arith.constant dense<0.000000e+00> : vector<32x32xf32>
    %68 = tpu.matmul %66, %67, %cst_37 {dimension_numbers = #tpu.dot_dimension_numbers<[1], [0], [0], [1], [0, 0, 1, 1], [], []>} : vector<32x32xbf16>, vector<32x32xbf16>, vector<32x32xf32> -> vector<32x32xf32>
    %c16 = arith.constant 16 : index
    %c0_38 = arith.constant 0 : index
    %69 = vector.load %arg2[%c16, %c0_38] : memref<19x32xf32, #tpu.memory_space<vmem>>, vector<1x32xf32>
    %70 = vector.broadcast %69 : vector<1x32xf32> to vector<32x32xf32>
    %71 = arith.addf %68, %70 : vector<32x32xf32>
    %72 = arith.addf %65, %71 : vector<32x32xf32>
    %cst_39 = arith.constant 0.000000e+00 : f32
    %73 = vector.broadcast %cst_39 : f32 to vector<32x32xf32>
    %74 = arith.maximumf %72, %73 : vector<32x32xf32>
    %c1 = arith.constant 1 : index
    %c0_40 = arith.constant 0 : index
    %75 = vector.load %arg2[%c1, %c0_40] : memref<19x32xf32, #tpu.memory_space<vmem>>, vector<1x32xf32>
    %c9 = arith.constant 9 : index
    %c0_41 = arith.constant 0 : index
    %76 = vector.load %arg2[%c9, %c0_41] : memref<19x32xf32, #tpu.memory_space<vmem>>, vector<1x32xf32>
    %c96 = arith.constant 96 : index
    %c0_42 = arith.constant 0 : index
    %77 = vector.load %arg1[%c96, %c0_42] : memref<1568x32xbf16, #tpu.memory_space<vmem>>, vector<96x32xbf16>
    %c4_i32_43 = arith.constant 4 : i32
    %78 = tpu.dynamic_rotate %74 by %c4_i32_43 dim 0 : vector<32x32xf32>, i32 -> vector<32x32xf32>
    %cst_44 = arith.constant 0.000000e+00 : f32
    %79 = vector.broadcast %cst_44 : f32 to vector<32x32xf32>
    %80 = arith.select %22, %78, %79 : vector<32x32xi1>, vector<32x32xf32>
    %81 = arith.truncf %80 : vector<32x32xf32> to vector<32x32xbf16>
    %c0_45 = arith.constant 0 : index
    %c0_46 = arith.constant 0 : index
    %82 = vector.load %arg4[%c0_45, %c0_46] : memref<32x96xbf16, #tpu.memory_space<vmem>>, vector<32x32xbf16>
    tpu.vector_store %arg4[%c0_45, %c0_46], %81 {strides = array<i32>} : memref<32x96xbf16, #tpu.memory_space<vmem>>, vector<32x32xbf16>,
    %c2_i32_47 = arith.constant 2 : i32
    %83 = tpu.dynamic_rotate %74 by %c2_i32_47 dim 0 : vector<32x32xf32>, i32 -> vector<32x32xf32>
    %cst_48 = arith.constant 0.000000e+00 : f32
    %84 = vector.broadcast %cst_48 : f32 to vector<32x32xf32>
    %85 = arith.select %20, %83, %84 : vector<32x32xi1>, vector<32x32xf32>
    %86 = arith.truncf %85 : vector<32x32xf32> to vector<32x32xbf16>
    %c0_49 = arith.constant 0 : index
    %c32_50 = arith.constant 32 : index
    %87 = vector.load %arg4[%c0_49, %c32_50] : memref<32x96xbf16, #tpu.memory_space<vmem>>, vector<32x32xbf16>
    tpu.vector_store %arg4[%c0_49, %c32_50], %86 {strides = array<i32>} : memref<32x96xbf16, #tpu.memory_space<vmem>>, vector<32x32xbf16>,
    %88 = arith.truncf %74 : vector<32x32xf32> to vector<32x32xbf16>
    %c0_51 = arith.constant 0 : index
    %c64_52 = arith.constant 64 : index
    %89 = vector.load %arg4[%c0_51, %c64_52] : memref<32x96xbf16, #tpu.memory_space<vmem>>, vector<32x32xbf16>
    tpu.vector_store %arg4[%c0_51, %c64_52], %88 {strides = array<i32>} : memref<32x96xbf16, #tpu.memory_space<vmem>>, vector<32x32xbf16>,
    %c0_53 = arith.constant 0 : index
    %c0_54 = arith.constant 0 : index
    %90 = vector.load %arg4[%c0_53, %c0_54] : memref<32x96xbf16, #tpu.memory_space<vmem>>, vector<32x96xbf16>
    %cst_55 = arith.constant dense<0.000000e+00> : vector<32x32xf32>
    %91 = tpu.matmul %90, %77, %cst_55 {dimension_numbers = #tpu.dot_dimension_numbers<[1], [0], [0], [1], [0, 0, 1, 1], [], []>} : vector<32x96xbf16>, vector<96x32xbf16>, vector<32x32xf32> -> vector<32x32xf32>
    %92 = vector.broadcast %75 : vector<1x32xf32> to vector<32x32xf32>
    %93 = arith.addf %91, %92 : vector<32x32xf32>
    %cst_56 = arith.constant 0.000000e+00 : f32
    %94 = vector.broadcast %cst_56 : f32 to vector<32x32xf32>
    %95 = arith.maximumf %93, %94 : vector<32x32xf32>
    %c864 = arith.constant 864 : index
    %c0_57 = arith.constant 0 : index
    %96 = vector.load %arg1[%c864, %c0_57] : memref<1568x32xbf16, #tpu.memory_space<vmem>>, vector<96x32xbf16>
    %c4_i32_58 = arith.constant 4 : i32
    %97 = tpu.dynamic_rotate %95 by %c4_i32_58 dim 0 : vector<32x32xf32>, i32 -> vector<32x32xf32>
    %cst_59 = arith.constant 0.000000e+00 : f32
    %98 = vector.broadcast %cst_59 : f32 to vector<32x32xf32>
    %99 = arith.select %22, %97, %98 : vector<32x32xi1>, vector<32x32xf32>
    %100 = arith.truncf %99 : vector<32x32xf32> to vector<32x32xbf16>
    %c0_60 = arith.constant 0 : index
    %c0_61 = arith.constant 0 : index
    %101 = vector.load %arg4[%c0_60, %c0_61] : memref<32x96xbf16, #tpu.memory_space<vmem>>, vector<32x32xbf16>
    tpu.vector_store %arg4[%c0_60, %c0_61], %100 {strides = array<i32>} : memref<32x96xbf16, #tpu.memory_space<vmem>>, vector<32x32xbf16>,
    %c2_i32_62 = arith.constant 2 : i32
    %102 = tpu.dynamic_rotate %95 by %c2_i32_62 dim 0 : vector<32x32xf32>, i32 -> vector<32x32xf32>
    %cst_63 = arith.constant 0.000000e+00 : f32
    %103 = vector.broadcast %cst_63 : f32 to vector<32x32xf32>
    %104 = arith.select %20, %102, %103 : vector<32x32xi1>, vector<32x32xf32>
    %105 = arith.truncf %104 : vector<32x32xf32> to vector<32x32xbf16>
    %c0_64 = arith.constant 0 : index
    %c32_65 = arith.constant 32 : index
    %106 = vector.load %arg4[%c0_64, %c32_65] : memref<32x96xbf16, #tpu.memory_space<vmem>>, vector<32x32xbf16>
    tpu.vector_store %arg4[%c0_64, %c32_65], %105 {strides = array<i32>} : memref<32x96xbf16, #tpu.memory_space<vmem>>, vector<32x32xbf16>,
    %107 = arith.truncf %95 : vector<32x32xf32> to vector<32x32xbf16>
    %c0_66 = arith.constant 0 : index
    %c64_67 = arith.constant 64 : index
    %108 = vector.load %arg4[%c0_66, %c64_67] : memref<32x96xbf16, #tpu.memory_space<vmem>>, vector<32x32xbf16>
    tpu.vector_store %arg4[%c0_66, %c64_67], %107 {strides = array<i32>} : memref<32x96xbf16, #tpu.memory_space<vmem>>, vector<32x32xbf16>,
    %c0_68 = arith.constant 0 : index
    %c0_69 = arith.constant 0 : index
    %109 = vector.load %arg4[%c0_68, %c0_69] : memref<32x96xbf16, #tpu.memory_space<vmem>>, vector<32x96xbf16>
    %cst_70 = arith.constant dense<0.000000e+00> : vector<32x32xf32>
    %110 = tpu.matmul %109, %96, %cst_70 {dimension_numbers = #tpu.dot_dimension_numbers<[1], [0], [0], [1], [0, 0, 1, 1], [], []>} : vector<32x96xbf16>, vector<96x32xbf16>, vector<32x32xf32> -> vector<32x32xf32>
    %111 = vector.broadcast %76 : vector<1x32xf32> to vector<32x32xf32>
    %112 = arith.addf %110, %111 : vector<32x32xf32>
    %cst_71 = arith.constant 0.000000e+00 : f32
    %113 = vector.broadcast %cst_71 : f32 to vector<32x32xf32>
    %114 = arith.maximumf %112, %113 : vector<32x32xf32>
    %115 = arith.addf %65, %114 : vector<32x32xf32>
    %116 = arith.addf %114, %74 : vector<32x32xf32>
    %cst_72 = arith.constant 0.000000e+00 : f32
    %117 = vector.broadcast %cst_72 : f32 to vector<32x32xf32>
    %118 = arith.maximumf %116, %117 : vector<32x32xf32>
    %c2 = arith.constant 2 : index
    %c0_73 = arith.constant 0 : index
    %119 = vector.load %arg2[%c2, %c0_73] : memref<19x32xf32, #tpu.memory_space<vmem>>, vector<1x32xf32>
    %c10 = arith.constant 10 : index
    %c0_74 = arith.constant 0 : index
    %120 = vector.load %arg2[%c10, %c0_74] : memref<19x32xf32, #tpu.memory_space<vmem>>, vector<1x32xf32>
    %c192 = arith.constant 192 : index
    %c0_75 = arith.constant 0 : index
    %121 = vector.load %arg1[%c192, %c0_75] : memref<1568x32xbf16, #tpu.memory_space<vmem>>, vector<96x32xbf16>
    %c8_i32_76 = arith.constant 8 : i32
    %122 = tpu.dynamic_rotate %118 by %c8_i32_76 dim 0 : vector<32x32xf32>, i32 -> vector<32x32xf32>
    %cst_77 = arith.constant 0.000000e+00 : f32
    %123 = vector.broadcast %cst_77 : f32 to vector<32x32xf32>
    %124 = arith.select %24, %122, %123 : vector<32x32xi1>, vector<32x32xf32>
    %125 = arith.truncf %124 : vector<32x32xf32> to vector<32x32xbf16>
    %c0_78 = arith.constant 0 : index
    %c0_79 = arith.constant 0 : index
    %126 = vector.load %arg4[%c0_78, %c0_79] : memref<32x96xbf16, #tpu.memory_space<vmem>>, vector<32x32xbf16>
    tpu.vector_store %arg4[%c0_78, %c0_79], %125 {strides = array<i32>} : memref<32x96xbf16, #tpu.memory_space<vmem>>, vector<32x32xbf16>,
    %c4_i32_80 = arith.constant 4 : i32
    %127 = tpu.dynamic_rotate %118 by %c4_i32_80 dim 0 : vector<32x32xf32>, i32 -> vector<32x32xf32>
    %cst_81 = arith.constant 0.000000e+00 : f32
    %128 = vector.broadcast %cst_81 : f32 to vector<32x32xf32>
    %129 = arith.select %22, %127, %128 : vector<32x32xi1>, vector<32x32xf32>
    %130 = arith.truncf %129 : vector<32x32xf32> to vector<32x32xbf16>
    %c0_82 = arith.constant 0 : index
    %c32_83 = arith.constant 32 : index
    %131 = vector.load %arg4[%c0_82, %c32_83] : memref<32x96xbf16, #tpu.memory_space<vmem>>, vector<32x32xbf16>
    tpu.vector_store %arg4[%c0_82, %c32_83], %130 {strides = array<i32>} : memref<32x96xbf16, #tpu.memory_space<vmem>>, vector<32x32xbf16>,
    %132 = arith.truncf %118 : vector<32x32xf32> to vector<32x32xbf16>
    %c0_84 = arith.constant 0 : index
    %c64_85 = arith.constant 64 : index
    %133 = vector.load %arg4[%c0_84, %c64_85] : memref<32x96xbf16, #tpu.memory_space<vmem>>, vector<32x32xbf16>
    tpu.vector_store %arg4[%c0_84, %c64_85], %132 {strides = array<i32>} : memref<32x96xbf16, #tpu.memory_space<vmem>>, vector<32x32xbf16>,
    %c0_86 = arith.constant 0 : index
    %c0_87 = arith.constant 0 : index
    %134 = vector.load %arg4[%c0_86, %c0_87] : memref<32x96xbf16, #tpu.memory_space<vmem>>, vector<32x96xbf16>
    %cst_88 = arith.constant dense<0.000000e+00> : vector<32x32xf32>
    %135 = tpu.matmul %134, %121, %cst_88 {dimension_numbers = #tpu.dot_dimension_numbers<[1], [0], [0], [1], [0, 0, 1, 1], [], []>} : vector<32x96xbf16>, vector<96x32xbf16>, vector<32x32xf32> -> vector<32x32xf32>
    %136 = vector.broadcast %119 : vector<1x32xf32> to vector<32x32xf32>
    %137 = arith.addf %135, %136 : vector<32x32xf32>
    %cst_89 = arith.constant 0.000000e+00 : f32
    %138 = vector.broadcast %cst_89 : f32 to vector<32x32xf32>
    %139 = arith.maximumf %137, %138 : vector<32x32xf32>
    %c960 = arith.constant 960 : index
    %c0_90 = arith.constant 0 : index
    %140 = vector.load %arg1[%c960, %c0_90] : memref<1568x32xbf16, #tpu.memory_space<vmem>>, vector<96x32xbf16>
    %c8_i32_91 = arith.constant 8 : i32
    %141 = tpu.dynamic_rotate %139 by %c8_i32_91 dim 0 : vector<32x32xf32>, i32 -> vector<32x32xf32>
    %cst_92 = arith.constant 0.000000e+00 : f32
    %142 = vector.broadcast %cst_92 : f32 to vector<32x32xf32>
    %143 = arith.select %24, %141, %142 : vector<32x32xi1>, vector<32x32xf32>
    %144 = arith.truncf %143 : vector<32x32xf32> to vector<32x32xbf16>
    %c0_93 = arith.constant 0 : index
    %c0_94 = arith.constant 0 : index
    %145 = vector.load %arg4[%c0_93, %c0_94] : memref<32x96xbf16, #tpu.memory_space<vmem>>, vector<32x32xbf16>
    tpu.vector_store %arg4[%c0_93, %c0_94], %144 {strides = array<i32>} : memref<32x96xbf16, #tpu.memory_space<vmem>>, vector<32x32xbf16>,
    %c4_i32_95 = arith.constant 4 : i32
    %146 = tpu.dynamic_rotate %139 by %c4_i32_95 dim 0 : vector<32x32xf32>, i32 -> vector<32x32xf32>
    %cst_96 = arith.constant 0.000000e+00 : f32
    %147 = vector.broadcast %cst_96 : f32 to vector<32x32xf32>
    %148 = arith.select %22, %146, %147 : vector<32x32xi1>, vector<32x32xf32>
    %149 = arith.truncf %148 : vector<32x32xf32> to vector<32x32xbf16>
    %c0_97 = arith.constant 0 : index
    %c32_98 = arith.constant 32 : index
    %150 = vector.load %arg4[%c0_97, %c32_98] : memref<32x96xbf16, #tpu.memory_space<vmem>>, vector<32x32xbf16>
    tpu.vector_store %arg4[%c0_97, %c32_98], %149 {strides = array<i32>} : memref<32x96xbf16, #tpu.memory_space<vmem>>, vector<32x32xbf16>,
    %151 = arith.truncf %139 : vector<32x32xf32> to vector<32x32xbf16>
    %c0_99 = arith.constant 0 : index
    %c64_100 = arith.constant 64 : index
    %152 = vector.load %arg4[%c0_99, %c64_100] : memref<32x96xbf16, #tpu.memory_space<vmem>>, vector<32x32xbf16>
    tpu.vector_store %arg4[%c0_99, %c64_100], %151 {strides = array<i32>} : memref<32x96xbf16, #tpu.memory_space<vmem>>, vector<32x32xbf16>,
    %c0_101 = arith.constant 0 : index
    %c0_102 = arith.constant 0 : index
    %153 = vector.load %arg4[%c0_101, %c0_102] : memref<32x96xbf16, #tpu.memory_space<vmem>>, vector<32x96xbf16>
    %cst_103 = arith.constant dense<0.000000e+00> : vector<32x32xf32>
    %154 = tpu.matmul %153, %140, %cst_103 {dimension_numbers = #tpu.dot_dimension_numbers<[1], [0], [0], [1], [0, 0, 1, 1], [], []>} : vector<32x96xbf16>, vector<96x32xbf16>, vector<32x32xf32> -> vector<32x32xf32>
    %155 = vector.broadcast %120 : vector<1x32xf32> to vector<32x32xf32>
    %156 = arith.addf %154, %155 : vector<32x32xf32>
    %cst_104 = arith.constant 0.000000e+00 : f32
    %157 = vector.broadcast %cst_104 : f32 to vector<32x32xf32>
    %158 = arith.maximumf %156, %157 : vector<32x32xf32>
    %159 = arith.addf %115, %158 : vector<32x32xf32>
    %160 = arith.addf %158, %118 : vector<32x32xf32>
    %cst_105 = arith.constant 0.000000e+00 : f32
    %161 = vector.broadcast %cst_105 : f32 to vector<32x32xf32>
    %162 = arith.maximumf %160, %161 : vector<32x32xf32>
    %c3 = arith.constant 3 : index
    %c0_106 = arith.constant 0 : index
    %163 = vector.load %arg2[%c3, %c0_106] : memref<19x32xf32, #tpu.memory_space<vmem>>, vector<1x32xf32>
    %c11 = arith.constant 11 : index
    %c0_107 = arith.constant 0 : index
    %164 = vector.load %arg2[%c11, %c0_107] : memref<19x32xf32, #tpu.memory_space<vmem>>, vector<1x32xf32>
    %c320 = arith.constant 320 : index
    %c0_108 = arith.constant 0 : index
    %165 = vector.load %arg1[%c320, %c0_108] : memref<1568x32xbf16, #tpu.memory_space<vmem>>, vector<64x32xbf16>
    %c8_i32_109 = arith.constant 8 : i32
    %166 = tpu.dynamic_rotate %162 by %c8_i32_109 dim 0 : vector<32x32xf32>, i32 -> vector<32x32xf32>
    %cst_110 = arith.constant 0.000000e+00 : f32
    %167 = vector.broadcast %cst_110 : f32 to vector<32x32xf32>
    %168 = arith.select %24, %166, %167 : vector<32x32xi1>, vector<32x32xf32>
    %169 = arith.truncf %168 : vector<32x32xf32> to vector<32x32xbf16>
    %c0_111 = arith.constant 0 : index
    %c0_112 = arith.constant 0 : index
    %170 = vector.load %arg4[%c0_111, %c0_112] : memref<32x96xbf16, #tpu.memory_space<vmem>>, vector<32x32xbf16>
    tpu.vector_store %arg4[%c0_111, %c0_112], %169 {strides = array<i32>} : memref<32x96xbf16, #tpu.memory_space<vmem>>, vector<32x32xbf16>,
    %171 = arith.truncf %162 : vector<32x32xf32> to vector<32x32xbf16>
    %c0_113 = arith.constant 0 : index
    %c32_114 = arith.constant 32 : index
    %172 = vector.load %arg4[%c0_113, %c32_114] : memref<32x96xbf16, #tpu.memory_space<vmem>>, vector<32x32xbf16>
    tpu.vector_store %arg4[%c0_113, %c32_114], %171 {strides = array<i32>} : memref<32x96xbf16, #tpu.memory_space<vmem>>, vector<32x32xbf16>,
    %c0_115 = arith.constant 0 : index
    %c0_116 = arith.constant 0 : index
    %173 = vector.load %arg4[%c0_115, %c0_116] : memref<32x96xbf16, #tpu.memory_space<vmem>>, vector<32x64xbf16>
    %cst_117 = arith.constant dense<0.000000e+00> : vector<32x32xf32>
    %174 = tpu.matmul %173, %165, %cst_117 {dimension_numbers = #tpu.dot_dimension_numbers<[1], [0], [0], [1], [0, 0, 1, 1], [], []>} : vector<32x64xbf16>, vector<64x32xbf16>, vector<32x32xf32> -> vector<32x32xf32>
    %175 = vector.broadcast %163 : vector<1x32xf32> to vector<32x32xf32>
    %176 = arith.addf %174, %175 : vector<32x32xf32>
    %cst_118 = arith.constant 0.000000e+00 : f32
    %177 = vector.broadcast %cst_118 : f32 to vector<32x32xf32>
    %178 = arith.maximumf %176, %177 : vector<32x32xf32>
    %c1088 = arith.constant 1088 : index
    %c0_119 = arith.constant 0 : index
    %179 = vector.load %arg1[%c1088, %c0_119] : memref<1568x32xbf16, #tpu.memory_space<vmem>>, vector<64x32xbf16>
    %c8_i32_120 = arith.constant 8 : i32
    %180 = tpu.dynamic_rotate %178 by %c8_i32_120 dim 0 : vector<32x32xf32>, i32 -> vector<32x32xf32>
    %cst_121 = arith.constant 0.000000e+00 : f32
    %181 = vector.broadcast %cst_121 : f32 to vector<32x32xf32>
    %182 = arith.select %24, %180, %181 : vector<32x32xi1>, vector<32x32xf32>
    %183 = arith.truncf %182 : vector<32x32xf32> to vector<32x32xbf16>
    %c0_122 = arith.constant 0 : index
    %c0_123 = arith.constant 0 : index
    %184 = vector.load %arg4[%c0_122, %c0_123] : memref<32x96xbf16, #tpu.memory_space<vmem>>, vector<32x32xbf16>
    tpu.vector_store %arg4[%c0_122, %c0_123], %183 {strides = array<i32>} : memref<32x96xbf16, #tpu.memory_space<vmem>>, vector<32x32xbf16>,
    %185 = arith.truncf %178 : vector<32x32xf32> to vector<32x32xbf16>
    %c0_124 = arith.constant 0 : index
    %c32_125 = arith.constant 32 : index
    %186 = vector.load %arg4[%c0_124, %c32_125] : memref<32x96xbf16, #tpu.memory_space<vmem>>, vector<32x32xbf16>
    tpu.vector_store %arg4[%c0_124, %c32_125], %185 {strides = array<i32>} : memref<32x96xbf16, #tpu.memory_space<vmem>>, vector<32x32xbf16>,
    %c0_126 = arith.constant 0 : index
    %c0_127 = arith.constant 0 : index
    %187 = vector.load %arg4[%c0_126, %c0_127] : memref<32x96xbf16, #tpu.memory_space<vmem>>, vector<32x64xbf16>
    %cst_128 = arith.constant dense<0.000000e+00> : vector<32x32xf32>
    %188 = tpu.matmul %187, %179, %cst_128 {dimension_numbers = #tpu.dot_dimension_numbers<[1], [0], [0], [1], [0, 0, 1, 1], [], []>} : vector<32x64xbf16>, vector<64x32xbf16>, vector<32x32xf32> -> vector<32x32xf32>
    %189 = vector.broadcast %164 : vector<1x32xf32> to vector<32x32xf32>
    %190 = arith.addf %188, %189 : vector<32x32xf32>
    %cst_129 = arith.constant 0.000000e+00 : f32
    %191 = vector.broadcast %cst_129 : f32 to vector<32x32xf32>
    %192 = arith.maximumf %190, %191 : vector<32x32xf32>
    %193 = arith.addf %159, %192 : vector<32x32xf32>
    %194 = arith.addf %192, %162 : vector<32x32xf32>
    %cst_130 = arith.constant 0.000000e+00 : f32
    %195 = vector.broadcast %cst_130 : f32 to vector<32x32xf32>
    %196 = arith.maximumf %194, %195 : vector<32x32xf32>
    %c4 = arith.constant 4 : index
    %c0_131 = arith.constant 0 : index
    %197 = vector.load %arg2[%c4, %c0_131] : memref<19x32xf32, #tpu.memory_space<vmem>>, vector<1x32xf32>
    %c12 = arith.constant 12 : index
    %c0_132 = arith.constant 0 : index
    %198 = vector.load %arg2[%c12, %c0_132] : memref<19x32xf32, #tpu.memory_space<vmem>>, vector<1x32xf32>
    %c448 = arith.constant 448 : index
    %c0_133 = arith.constant 0 : index
    %199 = vector.load %arg1[%c448, %c0_133] : memref<1568x32xbf16, #tpu.memory_space<vmem>>, vector<32x32xbf16>
    %200 = arith.truncf %196 : vector<32x32xf32> to vector<32x32xbf16>
    %cst_134 = arith.constant dense<0.000000e+00> : vector<32x32xf32>
    %201 = tpu.matmul %200, %199, %cst_134 {dimension_numbers = #tpu.dot_dimension_numbers<[1], [0], [0], [1], [0, 0, 1, 1], [], []>} : vector<32x32xbf16>, vector<32x32xbf16>, vector<32x32xf32> -> vector<32x32xf32>
    %202 = vector.broadcast %197 : vector<1x32xf32> to vector<32x32xf32>
    %203 = arith.addf %201, %202 : vector<32x32xf32>
    %cst_135 = arith.constant 0.000000e+00 : f32
    %204 = vector.broadcast %cst_135 : f32 to vector<32x32xf32>
    %205 = arith.maximumf %203, %204 : vector<32x32xf32>
    %c1216 = arith.constant 1216 : index
    %c0_136 = arith.constant 0 : index
    %206 = vector.load %arg1[%c1216, %c0_136] : memref<1568x32xbf16, #tpu.memory_space<vmem>>, vector<32x32xbf16>
    %207 = arith.truncf %205 : vector<32x32xf32> to vector<32x32xbf16>
    %cst_137 = arith.constant dense<0.000000e+00> : vector<32x32xf32>
    %208 = tpu.matmul %207, %206, %cst_137 {dimension_numbers = #tpu.dot_dimension_numbers<[1], [0], [0], [1], [0, 0, 1, 1], [], []>} : vector<32x32xbf16>, vector<32x32xbf16>, vector<32x32xf32> -> vector<32x32xf32>
    %209 = vector.broadcast %198 : vector<1x32xf32> to vector<32x32xf32>
    %210 = arith.addf %208, %209 : vector<32x32xf32>
    %cst_138 = arith.constant 0.000000e+00 : f32
    %211 = vector.broadcast %cst_138 : f32 to vector<32x32xf32>
    %212 = arith.maximumf %210, %211 : vector<32x32xf32>
    %213 = arith.addf %193, %212 : vector<32x32xf32>
    %214 = arith.addf %212, %196 : vector<32x32xf32>
    %cst_139 = arith.constant 0.000000e+00 : f32
    %215 = vector.broadcast %cst_139 : f32 to vector<32x32xf32>
    %216 = arith.maximumf %214, %215 : vector<32x32xf32>
    %c5 = arith.constant 5 : index
    %c0_140 = arith.constant 0 : index
    %217 = vector.load %arg2[%c5, %c0_140] : memref<19x32xf32, #tpu.memory_space<vmem>>, vector<1x32xf32>
    %c13 = arith.constant 13 : index
    %c0_141 = arith.constant 0 : index
    %218 = vector.load %arg2[%c13, %c0_141] : memref<19x32xf32, #tpu.memory_space<vmem>>, vector<1x32xf32>
    %c544 = arith.constant 544 : index
    %c0_142 = arith.constant 0 : index
    %219 = vector.load %arg1[%c544, %c0_142] : memref<1568x32xbf16, #tpu.memory_space<vmem>>, vector<32x32xbf16>
    %220 = arith.truncf %216 : vector<32x32xf32> to vector<32x32xbf16>
    %cst_143 = arith.constant dense<0.000000e+00> : vector<32x32xf32>
    %221 = tpu.matmul %220, %219, %cst_143 {dimension_numbers = #tpu.dot_dimension_numbers<[1], [0], [0], [1], [0, 0, 1, 1], [], []>} : vector<32x32xbf16>, vector<32x32xbf16>, vector<32x32xf32> -> vector<32x32xf32>
    %222 = vector.broadcast %217 : vector<1x32xf32> to vector<32x32xf32>
    %223 = arith.addf %221, %222 : vector<32x32xf32>
    %cst_144 = arith.constant 0.000000e+00 : f32
    %224 = vector.broadcast %cst_144 : f32 to vector<32x32xf32>
    %225 = arith.maximumf %223, %224 : vector<32x32xf32>
    %c1312 = arith.constant 1312 : index
    %c0_145 = arith.constant 0 : index
    %226 = vector.load %arg1[%c1312, %c0_145] : memref<1568x32xbf16, #tpu.memory_space<vmem>>, vector<32x32xbf16>
    %227 = arith.truncf %225 : vector<32x32xf32> to vector<32x32xbf16>
    %cst_146 = arith.constant dense<0.000000e+00> : vector<32x32xf32>
    %228 = tpu.matmul %227, %226, %cst_146 {dimension_numbers = #tpu.dot_dimension_numbers<[1], [0], [0], [1], [0, 0, 1, 1], [], []>} : vector<32x32xbf16>, vector<32x32xbf16>, vector<32x32xf32> -> vector<32x32xf32>
    %229 = vector.broadcast %218 : vector<1x32xf32> to vector<32x32xf32>
    %230 = arith.addf %228, %229 : vector<32x32xf32>
    %cst_147 = arith.constant 0.000000e+00 : f32
    %231 = vector.broadcast %cst_147 : f32 to vector<32x32xf32>
    %232 = arith.maximumf %230, %231 : vector<32x32xf32>
    %233 = arith.addf %213, %232 : vector<32x32xf32>
    %234 = arith.addf %232, %216 : vector<32x32xf32>
    %cst_148 = arith.constant 0.000000e+00 : f32
    %235 = vector.broadcast %cst_148 : f32 to vector<32x32xf32>
    %236 = arith.maximumf %234, %235 : vector<32x32xf32>
    %c6 = arith.constant 6 : index
    %c0_149 = arith.constant 0 : index
    %237 = vector.load %arg2[%c6, %c0_149] : memref<19x32xf32, #tpu.memory_space<vmem>>, vector<1x32xf32>
    %c14 = arith.constant 14 : index
    %c0_150 = arith.constant 0 : index
    %238 = vector.load %arg2[%c14, %c0_150] : memref<19x32xf32, #tpu.memory_space<vmem>>, vector<1x32xf32>
    %c640 = arith.constant 640 : index
    %c0_151 = arith.constant 0 : index
    %239 = vector.load %arg1[%c640, %c0_151] : memref<1568x32xbf16, #tpu.memory_space<vmem>>, vector<32x32xbf16>
    %240 = arith.truncf %236 : vector<32x32xf32> to vector<32x32xbf16>
    %cst_152 = arith.constant dense<0.000000e+00> : vector<32x32xf32>
    %241 = tpu.matmul %240, %239, %cst_152 {dimension_numbers = #tpu.dot_dimension_numbers<[1], [0], [0], [1], [0, 0, 1, 1], [], []>} : vector<32x32xbf16>, vector<32x32xbf16>, vector<32x32xf32> -> vector<32x32xf32>
    %242 = vector.broadcast %237 : vector<1x32xf32> to vector<32x32xf32>
    %243 = arith.addf %241, %242 : vector<32x32xf32>
    %cst_153 = arith.constant 0.000000e+00 : f32
    %244 = vector.broadcast %cst_153 : f32 to vector<32x32xf32>
    %245 = arith.maximumf %243, %244 : vector<32x32xf32>
    %c1408 = arith.constant 1408 : index
    %c0_154 = arith.constant 0 : index
    %246 = vector.load %arg1[%c1408, %c0_154] : memref<1568x32xbf16, #tpu.memory_space<vmem>>, vector<32x32xbf16>
    %247 = arith.truncf %245 : vector<32x32xf32> to vector<32x32xbf16>
    %cst_155 = arith.constant dense<0.000000e+00> : vector<32x32xf32>
    %248 = tpu.matmul %247, %246, %cst_155 {dimension_numbers = #tpu.dot_dimension_numbers<[1], [0], [0], [1], [0, 0, 1, 1], [], []>} : vector<32x32xbf16>, vector<32x32xbf16>, vector<32x32xf32> -> vector<32x32xf32>
    %249 = vector.broadcast %238 : vector<1x32xf32> to vector<32x32xf32>
    %250 = arith.addf %248, %249 : vector<32x32xf32>
    %cst_156 = arith.constant 0.000000e+00 : f32
    %251 = vector.broadcast %cst_156 : f32 to vector<32x32xf32>
    %252 = arith.maximumf %250, %251 : vector<32x32xf32>
    %253 = arith.addf %233, %252 : vector<32x32xf32>
    %254 = arith.addf %252, %236 : vector<32x32xf32>
    %cst_157 = arith.constant 0.000000e+00 : f32
    %255 = vector.broadcast %cst_157 : f32 to vector<32x32xf32>
    %256 = arith.maximumf %254, %255 : vector<32x32xf32>
    %c7 = arith.constant 7 : index
    %c0_158 = arith.constant 0 : index
    %257 = vector.load %arg2[%c7, %c0_158] : memref<19x32xf32, #tpu.memory_space<vmem>>, vector<1x32xf32>
    %c15 = arith.constant 15 : index
    %c0_159 = arith.constant 0 : index
    %258 = vector.load %arg2[%c15, %c0_159] : memref<19x32xf32, #tpu.memory_space<vmem>>, vector<1x32xf32>
    %c736 = arith.constant 736 : index
    %c0_160 = arith.constant 0 : index
    %259 = vector.load %arg1[%c736, %c0_160] : memref<1568x32xbf16, #tpu.memory_space<vmem>>, vector<32x32xbf16>
    %260 = arith.truncf %256 : vector<32x32xf32> to vector<32x32xbf16>
    %cst_161 = arith.constant dense<0.000000e+00> : vector<32x32xf32>
    %261 = tpu.matmul %260, %259, %cst_161 {dimension_numbers = #tpu.dot_dimension_numbers<[1], [0], [0], [1], [0, 0, 1, 1], [], []>} : vector<32x32xbf16>, vector<32x32xbf16>, vector<32x32xf32> -> vector<32x32xf32>
    %262 = vector.broadcast %257 : vector<1x32xf32> to vector<32x32xf32>
    %263 = arith.addf %261, %262 : vector<32x32xf32>
    %cst_162 = arith.constant 0.000000e+00 : f32
    %264 = vector.broadcast %cst_162 : f32 to vector<32x32xf32>
    %265 = arith.maximumf %263, %264 : vector<32x32xf32>
    %c1504 = arith.constant 1504 : index
    %c0_163 = arith.constant 0 : index
    %266 = vector.load %arg1[%c1504, %c0_163] : memref<1568x32xbf16, #tpu.memory_space<vmem>>, vector<32x32xbf16>
    %267 = arith.truncf %265 : vector<32x32xf32> to vector<32x32xbf16>
    %cst_164 = arith.constant dense<0.000000e+00> : vector<32x32xf32>
    %268 = tpu.matmul %267, %266, %cst_164 {dimension_numbers = #tpu.dot_dimension_numbers<[1], [0], [0], [1], [0, 0, 1, 1], [], []>} : vector<32x32xbf16>, vector<32x32xbf16>, vector<32x32xf32> -> vector<32x32xf32>
    %269 = vector.broadcast %258 : vector<1x32xf32> to vector<32x32xf32>
    %270 = arith.addf %268, %269 : vector<32x32xf32>
    %cst_165 = arith.constant 0.000000e+00 : f32
    %271 = vector.broadcast %cst_165 : f32 to vector<32x32xf32>
    %272 = arith.maximumf %270, %271 : vector<32x32xf32>
    %273 = arith.addf %253, %272 : vector<32x32xf32>
    %c17 = arith.constant 17 : index
    %c0_166 = arith.constant 0 : index
    %274 = vector.load %arg2[%c17, %c0_166] : memref<19x32xf32, #tpu.memory_space<vmem>>, vector<1x32xf32>
    %c18 = arith.constant 18 : index
    %c0_167 = arith.constant 0 : index
    %275 = vector.load %arg2[%c18, %c0_167] : memref<19x32xf32, #tpu.memory_space<vmem>>, vector<1x1xf32>
    %276 = vector.broadcast %274 : vector<1x32xf32> to vector<32x32xf32>
    %277 = arith.mulf %273, %276 : vector<32x32xf32>
    %cst_168 = arith.constant dense<0.000000e+00> : vector<32xf32>
    %278 = vector.multi_reduction <add>, %277, %cst_168 [1] : vector<32x32xf32> to vector<32xf32>
    %279 = vector.shape_cast %278 : vector<32xf32> to vector<32x1xf32>
    %280 = vector.extract_strided_slice %279 {offsets = [15, 0], sizes = [1, 1], strides = [1, 1]} : vector<32x1xf32> to vector<1x1xf32>
    %281 = arith.addf %280, %275 : vector<1x1xf32>
    %c0_169 = arith.constant 0 : index
    %c0_170 = arith.constant 0 : index
    %282 = vector.load %arg3[%c0_169, %c0_170] : memref<2x1xf32, #tpu.memory_space<vmem>>, vector<1x1xf32>
    tpu.vector_store %arg3[%c0_169, %c0_170], %281 {strides = array<i32>} : memref<2x1xf32, #tpu.memory_space<vmem>>, vector<1x1xf32>,
    %283 = vector.extract_strided_slice %279 {offsets = [31, 0], sizes = [1, 1], strides = [1, 1]} : vector<32x1xf32> to vector<1x1xf32>
    %284 = arith.addf %283, %275 : vector<1x1xf32>
    %c1_171 = arith.constant 1 : index
    %c0_172 = arith.constant 0 : index
    %285 = vector.load %arg3[%c1_171, %c0_172] : memref<2x1xf32, #tpu.memory_space<vmem>>, vector<1x1xf32>
    tpu.vector_store %arg3[%c1_171, %c0_172], %284 {strides = array<i32>} : memref<2x1xf32, #tpu.memory_space<vmem>>, vector<1x1xf32>,
    return
  }
}

</mosaic_0001>

<bundles_post_ra>
// kernel: original_tcn_model_forward.1
= control target key start
LH: loop header
LB: loop body
LE: loop exit
PB: predicated region body
PF: predicated region fallthrough
CT: control target
= control target key end

     0   :  { %v15_v0 = vlaneseq  ;;  %s2320_s18 = smov 64   ;;  %s2321_s23 = smov 32   ;;  %vm119_vm5 = vcmask 257024   ;;  %vm157_vm7 = vcmask 519424   ;;  %vm182_vm8 = vcmask 781824   ;;  %s3057_s0 = inlined_call_operand.vmem [shape: f32[32,32], index: 0, kind: input, shape index: {}]   ;;  %s3058_s1 = inlined_call_operand.vmem [shape: bf16[1568,32], index: 1, kind: input, shape index: {}]   ;;  %s3059_s2 = inlined_call_operand.vmem [shape: f32[19,32], index: 2, kind: input, shape index: {}]   ;;  %s3060_s3 = inlined_call_operand.vmem [shape: f32[2,1], index: 3, kind: output, shape index: {}]  }
   0x1   :  { %v84_v1 = vld [vmem:[%s3057_s0] sm:$0xff]  ;;  %v2349_v2 = vld [vmem:[%s3057_s0 + $0x18] sm:$0xff]  ;;  %v2226_v7 = vld [vmem:[%s3058_s1 + $0x28] sm:$0xff]  ;;  %vm238_vm9 = vcmask 785408   ;;  %vm464_vm10 = vcmask 261120   ;;  %vm1280_vm14 = vcmask 523264  }
   0x2   :  { %v2351_v3 = vshrl.u32 %v15_v0, 7  ;;  %v124_v4 = vrot.slane %v84_v1, 7  ;;  %v127_v5 = vrot.slane %v2349_v2, 7  ;;  %v2354_v6 = vpack.c.bf16 %v84_v1, %v84_v1  ;;  %v85_v9 = vld [vmem:[%s3057_s0 + $0x8] sm:$0xff]  ;;  %247 = vmatpush.bf16.msra.mxu0 %v2226_v7  ;;  %v86_v11 = vld [vmem:[%s3057_s0 + $0x10] sm:$0xff]  ;;  %v2225_v33 = vld [vmem:[%s3058_s1 + $0x20] sm:$0xff] }
   0x3   :  { %v125_v14 = vrot.slane %v85_v9, 7  ;;  %v126_v15 = vrot.slane %v86_v11, 7  ;;  %v2377_v17 = vpack.c.bf16 %v85_v9, %v85_v9  ;;  %v2396_v25 = vpack.c.bf16 %v2349_v2, %v2349_v2  ;;  %v2224_v34 = vld [vmem:[%s3058_s1 + $0x18] sm:$0xff]  ;;  %v2223_v38 = vld [vmem:[%s3058_s1 + $0x10] sm:$0xff]  ;;  %v2222_v40 = vld [vmem:[%s3058_s1 + $0x8] sm:$0xff] }
   0x4   :  { %v2360_v8 = vand.u32 15, %v2351_v3  ;;  %vm128_vm0 = vcmp.lt.s32.totalorder %v2351_v3, 1  ;;  %170 = vrot.lane.b32.xlu1 %v2354_v6, %s2320_s18  ;;  %v18_v12 = vadd.s32 16, %v2351_v3  ;;  %v2401_v27 = vpack.c.bf16 %v86_v11, %v86_v11  ;;  %v2221_v44 = vld [vmem:[%s3058_s1] sm:$0xff] }
   0x5   :  { %v132_v10 = vsel %vm128_vm0, %v127_v5, %v124_v4  ;;  %v130_v19 = vsel %vm128_vm0, %v125_v14, %v126_v15  ;;  %v131_v20 = vsel %vm128_vm0, %v124_v4, %v125_v14  ;;  %v129_v24 = vsel %vm128_vm0, %v126_v15, %v127_v5  ;;  %v2302_v61 = vld [vmem:[%s3059_s2] ss:$0 sm:$0xff] }
   0x6   :  { %vm68_vm1 = vcmp.ge.s32.totalorder %v2360_v8, 1  ;;  %v2379_v18 = vand.u32 15, %v18_v12  ;;  %v138_v23 = vpack.c.bf16 %v131_v20, %v131_v20  ;;  %v140_v26 = vpack.c.bf16 %v129_v24, %v129_v24  ;;  %248 = vmatpush.bf16.msra.mxu0 %v2225_v33 }
   0x7   :  { %v133_v13 = vsel %vm68_vm1, %v132_v10, 0.0  ;;  %v105_v28 = vrot.slane %v2349_v2, 6  ;;  %vm106_vm3 = vcmp.lt.s32.totalorder %v2351_v3, 2  ;;  %vm72_vm4 = vcmp.ge.s32.totalorder %v2360_v8, 2 }
   0x8   :  { %v137_v16 = vpack.c.bf16 %v133_v13, %v133_v13  ;;  %vm70_vm2 = vcmp.ge.s32.totalorder %v2379_v18, 1  ;;  %v102_v29 = vrot.slane %v84_v1, 6  ;;  %v103_v35 = vrot.slane %v85_v9, 6 }
   0x9   :  { %v135_v21 = vsel %vm70_vm2, %v130_v19, 0.0  ;;  %v104_v39 = vrot.slane %v86_v11, 6  ;;  %vm74_vm6 = vcmp.ge.s32.totalorder %v2379_v18, 2  ;;  %vm516_vm11 = vcmp.lt.s32.totalorder %v2351_v3, 4  ;;  %v2268_v3 = vld [vmem:[%s3058_s1 + $0x208] sm:$0xff] }
   0xa   :  { %145 = vrot.lane.b32.xlu0 %v137_v16, %s2321_s23  ;;  %v139_v22 = vpack.c.bf16 %v135_v21, %v135_v21  ;;  %v110_v30 = vsel %vm106_vm3, %v105_v28, %v102_v29  ;;  %249 = vmatpush.bf16.msra.mxu0 %v2224_v34  ;;  %v109_v36 = vsel %vm106_vm3, %v102_v29, %v103_v35  ;;  %v2234_v21 = vld [vmem:[%s3058_s1 + $0x1a8] sm:$0xff]  ;;  %vm78_vm12 = vcmp.ge.s32.totalorder %v2379_v18, 4 }
   0xb   :  { %v111_v31 = vsel %vm72_vm4, %v110_v30, 0.0  ;;  %v116_v37 = vpack.c.bf16 %v109_v36, %v109_v36  ;;  %v108_v41 = vsel %vm106_vm3, %v103_v35, %v104_v39  ;;  %v107_v46 = vsel %vm106_vm3, %v104_v39, %v105_v28  ;;  %419 = vmatpush.bf16.msra.mxu1 %v2234_v21 }
   0xc   :  { %172 = vrot.lane.b32.xlu1 %v2377_v17, %s2320_s18  ;;  %149 = vrot.lane.b32.xlu2 %v139_v22, %s2321_s23  ;;  %v115_v32 = vpack.c.bf16 %v111_v31, %v111_v31  ;;  %v113_v42 = vsel %vm74_vm6, %v108_v41, 0.0  ;;  %v118_v47 = vpack.c.bf16 %v107_v46, %v107_v46  ;;  %vm76_vm13 = vcmp.ge.s32.totalorder %v2360_v8, 4  ;;  %v2267_v8 = vld [vmem:[%s3058_s1 + $0x200] sm:$0xff] }
   0xd   :  { %121 = vst.msk [vmem:[#allocation2 + $0x4] sm:$0xf] %vm119_vm5, %v116_v37  ;;  %v117_v43 = vpack.c.bf16 %v113_v42, %v113_v42  ;;  %vm1867_vm15 = vcmask 7175  }
   0xe   :  { %120 = vst.msk [vmem:[#allocation2] sm:$0xf] %vm119_vm5, %v115_v32  ;;  %250 = vmatpush.bf16.msra.mxu0 %v2223_v38 }
   0xf   :  { %122 = vst.msk [vmem:[#allocation2 + $0x8] sm:$0xf] %vm119_vm5, %v117_v43 }
  0x10   :  { %123 = vst.msk [vmem:[#allocation2 + $0xc] sm:$0xf] %vm119_vm5, %v118_v47 }
  0x12   :  { %147 = vrot.lane.b32.xlu0 %v138_v23, %s2321_s23  ;;  %251 = vmatpush.bf16.msra.mxu0 %v2222_v40 }
  0x14   :  { %176 = vrot.lane.b32.xlu1 %v2396_v25, %s2320_s18  ;;  %151 = vrot.lane.b32.xlu2 %v140_v26, %s2321_s23 }
  0x16   :  { %252 = vmatpush.bf16.msra.mxu0 %v2221_v44 }
  0x1a   :  { %174 = vrot.lane.b32.xlu0 %v2401_v27, %s2320_s18 }
  0x66   :  { %v150_v45 = vpop.permute.xlu2 %149 }
  0x67   :  { %160 = vst.msk [vmem:[#allocation2 + $0x8] sm:$0xf] %vm157_vm7, %v150_v45 }
  0x6e   :  { %v152_v48 = vpop.permute.xlu2 %151 }
  0x6f   :  { %161 = vst.msk [vmem:[#allocation2 + $0xc] sm:$0xf] %vm157_vm7, %v152_v48 }
  0x76   :  { %v171_v49 = vpop.permute.xlu1 %170 }
  0x7c   :  { %v146_v50 = vpop.permute.xlu0 %145 }
  0x7d   :  { %158 = vst.msk [vmem:[#allocation2] sm:$0xf] %vm157_vm7, %v146_v50  ;;  %v2233_v50 = vld [vmem:[%s3058_s1 + $0x1a0] sm:$0xff] }
  0x7e   :  { %183 = vst.msk [vmem:[#allocation2] sm:$0xf] %vm182_vm8, %v171_v49  ;;  %v173_v51 = vpop.permute.xlu1 %172  ;;  %420 = vmatpush.bf16.msra.mxu1 %v2233_v50 }
  0x84   :  { %v148_v52 = vpop.permute.xlu0 %147 }
  0x85   :  { %159 = vst.msk [vmem:[#allocation2 + $0x4] sm:$0xf] %vm157_vm7, %v148_v52  ;;  %v1877_v55 = vld [vmem:[#allocation2] sm:$0xf]  ;;  %v446_v52 = vunpack.c.l.b16 %v2354_v6  ;;  %v2230_v6 = vld [vmem:[%s3058_s1 + $0x188] sm:$0xff] }
  0x86   :  { %184 = vst.msk [vmem:[#allocation2 + $0x4] sm:$0xf] %vm182_vm8, %v173_v51  ;;  %v177_v53 = vpop.permute.xlu1 %176  ;;  %v2238_v51 = vld [vmem:[%s3058_s1 + $0x308] sm:$0xff] }
  0x87   :  { %186 = vst.msk [vmem:[#allocation2 + $0xc] sm:$0xf] %vm182_vm8, %v177_v53  ;;  %477 = vmatpush.bf16.msra.mxu2 %v2238_v51  ;;  %v2232_v53 = vld [vmem:[%s3058_s1 + $0x198] sm:$0xff] }
  0x88   :  { %421 = vmatpush.bf16.msra.mxu1 %v2232_v53 }
  0x8c   :  { %v175_v54 = vpop.permute.xlu0 %174 }
  0x8d   :  { %v2227_v56 = vld [vmem:[#allocation2] sm:$0xf0]  ;;  %185 = vst.msk [vmem:[#allocation2 + $0x8] sm:$0xf] %vm182_vm8, %v175_v54 }
  0x8e   :  { %v1878_v57 = vor.u32 %v2227_v56, %v1877_v55  ;;  %v2228_v58 = vld [vmem:[#allocation2 + $0x8] sm:$0xf0]  ;;  %v2237_v54 = vld [vmem:[%s3058_s1 + $0x300] sm:$0xff]  ;;  %v447_v55 = vunpack.c.l.b16 %v2377_v17 }
  0x8f   :  { %478 = vmatpush.bf16.msra.mxu2 %v2237_v54  ;;  %v2229_v17 = vld [vmem:[%s3058_s1 + $0x180] sm:$0xff] }
  0x90   :  { %1907 = vmatmul.msk.bf16.vlgmr.msra.gmra.mxu0 %vm238_vm9, %v1878_v57  ;;  %v450_v56 = vpack.c.b16 %v447_v55, %v446_v52  ;;  %v2231_v57 = vld [vmem:[%s3058_s1 + $0x190] sm:$0xff] }
  0x91   :  { %422 = vmatpush.bf16.msra.mxu1 %v2231_v57 }
  0x92   :  { %1951 = vmatmul.msk.bf16.vlgmr.msra.gmra.mxu2 %vm464_vm10, %v450_v56 }
  0x94   :  { %v1881_v59 = vld [vmem:[#allocation2 + $0x8] sm:$0xf] }
  0x95   :  { %v1882_v60 = vor.u32 %v2228_v58, %v1881_v59  ;;  %423 = vmatpush.bf16.msra.mxu1 %v2230_v6  ;;  %v448_v58 = vunpack.c.l.b16 %v2401_v27  ;;  %v449_v59 = vunpack.c.l.b16 %v2396_v25 }
  0x99   :  { %424 = vmatpush.bf16.msra.mxu1 %v2229_v17 }
  0x9d   :  { %1164 = vmatpush.bf16.msrb.mxu1 %v2268_v3 }
  0xa0   :  { %1908 = vmatmul.msk.bf16.gmra.mxu0 %vm238_vm9, %v1882_v60  ;;  %v451_v60 = vpack.c.b16 %v449_v59, %v448_v58 }
  0xa1   :  { %1165 = vmatpush.bf16.msrb.mxu1 %v2267_v8 }
  0xa2   :  { %1952 = vmatmul.msk.bf16.gmra.mxu2 %vm464_vm10, %v451_v60 }
 0x10d   :  { %v254_v62 = vpop.f32.mrf.mxu0 }
 0x10e   :  { %v255_v63 = vadd.f32 %v2302_v61, %v254_v62 }
 0x110   :  { %v264_v0 = vmax.f32 %v255_v63, 0.0 }
 0x112   :  { %v336_v1 = vpack.c.bf16 %v264_v0, %v264_v0  ;;  %v280_v7 = vrot.slane %v264_v0, 6  ;;  %v300_v9 = vrot.slane %v264_v0, 7 }
 0x114   :  { %344 = vrot.lane.b32.xlu1 %v336_v1, %s2320_s18 }
 0x115   :  { %v256_v2 = vpop.f32.mrf.mxu0 }
 0x116   :  { %v257_v4 = vadd.f32 %v2302_v61, %v256_v2 }
 0x118   :  { %v265_v5 = vmax.f32 %v257_v4, 0.0 }
 0x11a   :  { %v281_v10 = vrot.slane %v265_v5, 6  ;;  %v301_v11 = vrot.slane %v265_v5, 7  ;;  %v337_v48 = vpack.c.bf16 %v265_v5, %v265_v5 }
 0x11c   :  { %v286_v12 = vsel %vm106_vm3, %v280_v7, %v281_v10  ;;  %v306_v13 = vsel %vm128_vm0, %v300_v9, %v301_v11 }
 0x11d   :  { %v293_v14 = vpack.c.bf16 %v286_v12, %v286_v12  ;;  %v259_v15 = vpop.f32.mrf.mxu0  ;;  %v313_v16 = vpack.c.bf16 %v306_v13, %v306_v13  ;;  %v480_v12 = vpop.f32.mrf.mxu2  ;;  %v2303_v13 = vld [vmem:[%s3059_s2 + $0x10] ss:$0 sm:$0xff] }
 0x11e   :  { %v260_v19 = vadd.f32 %v2302_v61, %v259_v15 }
 0x11f   :  { %297 = vst.msk [vmem:[#allocation2 + $0x4] sm:$0xf] %vm119_vm5, %v293_v14  ;;  %322 = vrot.lane.b32.xlu0 %v313_v16, %s2321_s23  ;;  %v2304_v14 = vld [vmem:[%s3059_s2 + $0x8] ss:$0 sm:$0xff]  ;;  %v481_v16 = vadd.f32 %v2303_v13, %v480_v12 }
 0x120   :  { %v266_v20 = vmax.f32 %v260_v19, 0.0 }
 0x122   :  { %v282_v22 = vrot.slane %v266_v20, 6  ;;  %v302_v23 = vrot.slane %v266_v20, 7  ;;  %v338_v49 = vpack.c.bf16 %v266_v20, %v266_v20 }
 0x124   :  { %v285_v24 = vsel %vm106_vm3, %v281_v10, %v282_v22  ;;  %v305_v26 = vsel %vm128_vm0, %v301_v11, %v302_v23 }
 0x125   :  { %v290_v28 = vsel %vm74_vm6, %v285_v24, 0.0  ;;  %v261_v29 = vpop.f32.mrf.mxu0  ;;  %v310_v30 = vsel %vm70_vm2, %v305_v26, 0.0  ;;  %v482_v21 = vpop.f32.mrf.mxu2 }
 0x126   :  { %v294_v31 = vpack.c.bf16 %v290_v28, %v290_v28  ;;  %v262_v32 = vadd.f32 %v2302_v61, %v261_v29  ;;  %v314_v33 = vpack.c.bf16 %v310_v30, %v310_v30  ;;  %v483_v29 = vadd.f32 %v2303_v13, %v482_v21  ;;  %v2240_v21 = vld [vmem:[%s3058_s1 + $0x38] sm:$0xff] }
 0x128   :  { %298 = vst.msk [vmem:[#allocation2 + $0x8] sm:$0xf] %vm119_vm5, %v294_v31  ;;  %v267_v34 = vmax.f32 %v262_v32, 0.0  ;;  %324 = vrot.lane.b32.xlu0 %v314_v33, %s2321_s23 }
 0x12a   :  { %v283_v35 = vrot.slane %v267_v34, 6  ;;  %v303_v36 = vrot.slane %v267_v34, 7  ;;  %v339_v47 = vpack.c.bf16 %v267_v34, %v267_v34 }
 0x12c   :  { %v284_v37 = vsel %vm106_vm3, %v282_v22, %v283_v35  ;;  %v287_v38 = vsel %vm106_vm3, %v283_v35, %v280_v7  ;;  %v304_v39 = vsel %vm128_vm0, %v302_v23, %v303_v36  ;;  %v307_v40 = vsel %vm128_vm0, %v303_v36, %v300_v9 }
 0x12d   :  { %v288_v41 = vsel %vm72_vm4, %v287_v38, 0.0  ;;  %v295_v42 = vpack.c.bf16 %v284_v37, %v284_v37  ;;  %v315_v43 = vpack.c.bf16 %v304_v39, %v304_v39  ;;  %v308_v44 = vsel %vm68_vm1, %v307_v40, 0.0  ;;  %v485_v32 = vpop.f32.mrf.mxu2 }
 0x12e   :  { %v292_v45 = vpack.c.bf16 %v288_v41, %v288_v41  ;;  %v312_v46 = vpack.c.bf16 %v308_v44, %v308_v44  ;;  %v486_v35 = vadd.f32 %v2303_v13, %v485_v32 }
 0x12f   :  { %299 = vst.msk [vmem:[#allocation2 + $0xc] sm:$0xf] %vm119_vm5, %v295_v42  ;;  %326 = vrot.lane.b32.xlu1 %v315_v43, %s2321_s23 }
 0x130   :  { %296 = vst.msk [vmem:[#allocation2] sm:$0xf] %vm119_vm5, %v292_v45  ;;  %320 = vrot.lane.b32.xlu2 %v312_v46, %s2321_s23  ;;  %350 = vrot.lane.b32.xlu0 %v339_v47, %s2320_s18 }
 0x138   :  { %346 = vrot.lane.b32.xlu2 %v337_v48, %s2320_s18  ;;  %v487_v48 = vpop.f32.mrf.mxu2 }
 0x139   :  { %v488_v54 = vadd.f32 %v2303_v13, %v487_v48  ;;  %v2244_v13 = vld [vmem:[%s3058_s1 + $0x58] sm:$0xff] }
 0x13a   :  { %652 = vmatpush.bf16.msra.mxu3 %v2244_v13 }
 0x140   :  { %348 = vrot.lane.b32.xlu2 %v338_v49, %s2320_s18 }
 0x186   :  { %v345_v62 = vpop.permute.xlu1 %344 }
 0x18a   :  { %v321_v61 = vpop.permute.xlu2 %320 }
 0x18b   :  { %332 = vst.msk [vmem:[#allocation2] sm:$0xf] %vm157_vm7, %v321_v61 }
 0x18c   :  { %356 = vst.msk [vmem:[#allocation2] sm:$0xf] %vm182_vm8, %v345_v62 }
 0x191   :  { %v323_v63 = vpop.permute.xlu0 %322 }
 0x192   :  { %333 = vst.msk [vmem:[#allocation2 + $0x4] sm:$0xf] %vm157_vm7, %v323_v63  ;;  %v347_v0 = vpop.permute.xlu2 %346 }
 0x193   :  { %357 = vst.msk [vmem:[#allocation2 + $0x4] sm:$0xf] %vm182_vm8, %v347_v0  ;;  %v1911_v1 = vld [vmem:[#allocation2] sm:$0xf] }
 0x19a   :  { %v2235_v2 = vld [vmem:[#allocation2] sm:$0xf0]  ;;  %v349_v27 = vpop.permute.xlu2 %348  ;;  %v325_v4 = vpop.permute.xlu0 %324 }
 0x19b   :  { %334 = vst.msk [vmem:[#allocation2 + $0x8] sm:$0xf] %vm157_vm7, %v325_v4  ;;  %v1912_v25 = vor.u32 %v2235_v2, %v1911_v1 }
 0x19c   :  { %358 = vst.msk [vmem:[#allocation2 + $0x8] sm:$0xf] %vm182_vm8, %v349_v27 }
 0x19d   :  { %1941 = vmatmul.msk.bf16.vlgmr.msra.gmra.mxu1 %vm238_vm9, %v1912_v25 }
 0x1a1   :  { %v327_v5 = vpop.permute.xlu1 %326 }
 0x1a2   :  { %335 = vst.msk [vmem:[#allocation2 + $0xc] sm:$0xf] %vm157_vm7, %v327_v5  ;;  %v351_v7 = vpop.permute.xlu0 %350 }
 0x1a3   :  { %359 = vst.msk [vmem:[#allocation2 + $0xc] sm:$0xf] %vm182_vm8, %v351_v7  ;;  %v1915_v9 = vld [vmem:[#allocation2 + $0x8] sm:$0xf] }
 0x1aa   :  { %v2236_v10 = vld [vmem:[#allocation2 + $0x8] sm:$0xf0] }
 0x1ab   :  { %v1916_v11 = vor.u32 %v2236_v10, %v1915_v9 }
 0x1ad   :  { %1942 = vmatmul.msk.bf16.gmra.mxu1 %vm238_vm9, %v1916_v11 }
 0x21a   :  { %v426_v15 = vpop.f32.mrf.mxu1 }
 0x21b   :  { %v427_v19 = vadd.f32 %v2304_v14, %v426_v15  ;;  %v2243_v15 = vld [vmem:[%s3058_s1 + $0x50] sm:$0xff] }
 0x21c   :  { %653 = vmatpush.bf16.msra.mxu3 %v2243_v15 }
 0x21d   :  { %v436_v20 = vmax.f32 %v427_v19, 0.0  ;;  %v2242_v19 = vld [vmem:[%s3058_s1 + $0x48] sm:$0xff] }
 0x21f   :  { %v490_v22 = vadd.f32 %v481_v16, %v436_v20  ;;  %v2241_v20 = vld [vmem:[%s3058_s1 + $0x40] sm:$0xff] }
 0x220   :  { %654 = vmatpush.bf16.msra.mxu3 %v2242_v19 }
 0x221   :  { %v2536_v23 = vmax.f32 %v490_v22, 0.0  ;;  %v2239_v22 = vld [vmem:[%s3058_s1 + $0x30] sm:$0xff] }
 0x222   :  { %v428_v24 = vpop.f32.mrf.mxu1 }
 0x223   :  { %v2538_v26 = vadd.f32 %v2304_v14, %v428_v24  ;;  %v569_v28 = vpack.c.bf16 %v2536_v23, %v2536_v23  ;;  %v512_v34 = vrot.slane %v2536_v23, 4  ;;  %v533_v39 = vrot.slane %v2536_v23, 6 }
 0x224   :  { %655 = vmatpush.bf16.msra.mxu3 %v2241_v20 }
 0x225   :  { %v437_v30 = vmax.f32 %v2538_v26, 0.0  ;;  %577 = vrot.lane.b32.xlu0 %v569_v28, %s2320_s18 }
 0x227   :  { %v491_v31 = vadd.f32 %v483_v29, %v437_v30 }
 0x228   :  { %656 = vmatpush.bf16.msra.mxu3 %v2240_v21 }
 0x229   :  { %v2546_v33 = vmax.f32 %v491_v31, 0.0 }
 0x22a   :  { %v431_v36 = vpop.f32.mrf.mxu1 }
 0x22b   :  { %v513_v37 = vrot.slane %v2546_v33, 4  ;;  %v432_v38 = vadd.f32 %v2304_v14, %v431_v36  ;;  %v534_v40 = vrot.slane %v2546_v33, 6  ;;  %v570_v11 = vpack.c.bf16 %v2546_v33, %v2546_v33 }
 0x22c   :  { %657 = vmatpush.bf16.msra.mxu3 %v2239_v22 }
 0x22d   :  { %v519_v41 = vsel %vm516_vm11, %v512_v34, %v513_v37  ;;  %v438_v42 = vmax.f32 %v432_v38, 0.0  ;;  %v539_v43 = vsel %vm106_vm3, %v533_v39, %v534_v40 }
 0x22e   :  { %v526_v44 = vpack.c.bf16 %v519_v41, %v519_v41  ;;  %v546_v45 = vpack.c.bf16 %v539_v43, %v539_v43  ;;  %v2305_v41 = vld [vmem:[%s3059_s2 + $0x1] ss:$0 sm:$0xff] }
 0x22f   :  { %v492_v46 = vadd.f32 %v486_v35, %v438_v42 }
 0x230   :  { %530 = vst.msk [vmem:[#allocation2 + $0x4] sm:$0xf] %vm119_vm5, %v526_v44  ;;  %555 = vrot.lane.b32.xlu2 %v546_v45, %s2321_s23 }
 0x231   :  { %v2559_v47 = vmax.f32 %v492_v46, 0.0 }
 0x232   :  { %v433_v49 = vpop.f32.mrf.mxu1 }
 0x233   :  { %v514_v50 = vrot.slane %v2559_v47, 4  ;;  %v2563_v51 = vadd.f32 %v2304_v14, %v433_v49  ;;  %v535_v52 = vrot.slane %v2559_v47, 6  ;;  %v571_v12 = vpack.c.bf16 %v2559_v47, %v2559_v47 }
 0x235   :  { %v518_v53 = vsel %vm516_vm11, %v513_v37, %v514_v50  ;;  %v439_v55 = vmax.f32 %v2563_v51, 0.0  ;;  %v538_v56 = vsel %vm106_vm3, %v534_v40, %v535_v52  ;;  %v2273_v51 = vld [vmem:[%s3058_s1 + $0xb0] sm:$0xff] }
 0x236   :  { %v523_v57 = vsel %vm78_vm12, %v518_v53, 0.0  ;;  %v543_v6 = vsel %vm74_vm6, %v538_v56, 0.0 }
 0x237   :  { %v527_v17 = vpack.c.bf16 %v523_v57, %v523_v57  ;;  %v493_v58 = vadd.f32 %v488_v54, %v439_v55  ;;  %v547_v59 = vpack.c.bf16 %v543_v6, %v543_v6 }
 0x239   :  { %531 = vst.msk [vmem:[#allocation2 + $0x8] sm:$0xf] %vm119_vm5, %v527_v17  ;;  %v2578_v60 = vmax.f32 %v493_v58, 0.0  ;;  %557 = vrot.lane.b32.xlu2 %v547_v59, %s2321_s23 }
 0x23b   :  { %v515_v61 = vrot.slane %v2578_v60, 4  ;;  %v536_v62 = vrot.slane %v2578_v60, 6  ;;  %v572_v10 = vpack.c.bf16 %v2578_v60, %v2578_v60 }
 0x23d   :  { %v517_v63 = vsel %vm516_vm11, %v514_v50, %v515_v61  ;;  %v520_v0 = vsel %vm516_vm11, %v515_v61, %v512_v34  ;;  %v537_v1 = vsel %vm106_vm3, %v535_v52, %v536_v62  ;;  %v540_v2 = vsel %vm106_vm3, %v536_v62, %v533_v39 }
 0x23e   :  { %v521_v27 = vsel %vm76_vm13, %v520_v0, 0.0  ;;  %v528_v4 = vpack.c.bf16 %v517_v63, %v517_v63  ;;  %v548_v25 = vpack.c.bf16 %v537_v1, %v537_v1  ;;  %v541_v5 = vsel %vm72_vm4, %v540_v2, 0.0 }
 0x23f   :  { %v525_v7 = vpack.c.bf16 %v521_v27, %v521_v27  ;;  %v545_v9 = vpack.c.bf16 %v541_v5, %v541_v5 }
 0x240   :  { %532 = vst.msk [vmem:[#allocation2 + $0xc] sm:$0xf] %vm119_vm5, %v528_v4  ;;  %559 = vrot.lane.b32.xlu0 %v548_v25, %s2321_s23 }
 0x241   :  { %529 = vst.msk [vmem:[#allocation2] sm:$0xf] %vm119_vm5, %v525_v7  ;;  %553 = vrot.lane.b32.xlu1 %v545_v9, %s2321_s23  ;;  %583 = vrot.lane.b32.xlu2 %v572_v10, %s2320_s18 }
 0x249   :  { %579 = vrot.lane.b32.xlu1 %v570_v11, %s2320_s18 }
 0x251   :  { %581 = vrot.lane.b32.xlu1 %v571_v12, %s2320_s18 }
 0x28a   :  { %v556_v14 = vpop.permute.xlu2 %555 }
 0x28b   :  { %566 = vst.msk [vmem:[#allocation2 + $0x4] sm:$0xf] %vm157_vm7, %v556_v14 }
 0x293   :  { %v558_v16 = vpop.permute.xlu2 %557 }
 0x294   :  { %567 = vst.msk [vmem:[#allocation2 + $0x8] sm:$0xf] %vm157_vm7, %v558_v16 }
 0x297   :  { %v578_v24 = vpop.permute.xlu0 %577 }
 0x29b   :  { %v584_v29 = vpop.permute.xlu2 %583 }
 0x2b2   :  { %v560_v28 = vpop.permute.xlu0 %559 }
 0x2b3   :  { %568 = vst.msk [vmem:[#allocation2 + $0xc] sm:$0xf] %vm157_vm7, %v560_v28  ;;  %v554_v31 = vpop.permute.xlu1 %553 }
 0x2b4   :  { %592 = vst.msk [vmem:[#allocation2 + $0xc] sm:$0xf] %vm182_vm8, %v584_v29 }
 0x2b5   :  { %565 = vst.msk [vmem:[#allocation2] sm:$0xf] %vm157_vm7, %v554_v31 }
 0x2b6   :  { %589 = vst.msk [vmem:[#allocation2] sm:$0xf] %vm182_vm8, %v578_v24 }
 0x2bb   :  { %v580_v32 = vpop.permute.xlu1 %579  ;;  %v2246_v39 = vld [vmem:[#allocation2 + $0x8] sm:$0xf0] }
 0x2bc   :  { %590 = vst.msk [vmem:[#allocation2 + $0x4] sm:$0xf] %vm182_vm8, %v580_v32  ;;  %v2252_v32 = vld [vmem:[%s3058_s1 + $0x1d8] sm:$0xff] }
 0x2bd   :  { %v1955_v34 = vld [vmem:[#allocation2] sm:$0xf]  ;;  %824 = vmatpush.bf16.msrb.mxu2 %v2252_v32 }
 0x2c3   :  { %v2245_v35 = vld [vmem:[#allocation2] sm:$0xf0]  ;;  %v582_v36 = vpop.permute.xlu1 %581 }
 0x2c4   :  { %591 = vst.msk [vmem:[#allocation2 + $0x8] sm:$0xf] %vm182_vm8, %v582_v36  ;;  %v1956_v37 = vor.u32 %v2245_v35, %v1955_v34  ;;  %v2251_v34 = vld [vmem:[%s3058_s1 + $0x1d0] sm:$0xff]  ;;  %v2250_v35 = vld [vmem:[%s3058_s1 + $0x1c8] sm:$0xff] }
 0x2c5   :  { %825 = vmatpush.bf16.msrb.mxu2 %v2251_v34 }
 0x2c6   :  { %1985 = vmatmul.msk.bf16.vlgmr.msra.gmra.mxu3 %vm238_vm9, %v1956_v37  ;;  %v2249_v37 = vld [vmem:[%s3058_s1 + $0x1c0] sm:$0xff] }
 0x2c9   :  { %826 = vmatpush.bf16.msrb.mxu2 %v2250_v35 }
 0x2cb   :  { %v1959_v38 = vld [vmem:[#allocation2 + $0x8] sm:$0xf] }
 0x2cc   :  { %v1960_v40 = vor.u32 %v2246_v39, %v1959_v38  ;;  %v2248_v39 = vld [vmem:[%s3058_s1 + $0x1b8] sm:$0xff] }
 0x2cd   :  { %827 = vmatpush.bf16.msrb.mxu2 %v2249_v37  ;;  %v2257_v37 = vld [vmem:[%s3058_s1 + $0x70] sm:$0xff] }
 0x2d1   :  { %828 = vmatpush.bf16.msrb.mxu2 %v2248_v39  ;;  %v2255_v39 = vld [vmem:[%s3058_s1 + $0x60] sm:$0xff] }
 0x2d6   :  { %1986 = vmatmul.msk.bf16.gmra.mxu3 %vm238_vm9, %v1960_v40  ;;  %v2247_v40 = vld [vmem:[%s3058_s1 + $0x1b0] sm:$0xff] }
 0x2d7   :  { %829 = vmatpush.bf16.msrb.mxu2 %v2247_v40 }
 0x349   :  { %v659_v42 = vpop.f32.mrf.mxu3 }
 0x34a   :  { %v660_v43 = vadd.f32 %v2305_v41, %v659_v42 }
 0x34c   :  { %v669_v44 = vmax.f32 %v660_v43, 0.0 }
 0x34e   :  { %v741_v45 = vpack.c.bf16 %v669_v44, %v669_v44  ;;  %v685_v50 = vrot.slane %v669_v44, 4  ;;  %v705_v52 = vrot.slane %v669_v44, 6 }
 0x350   :  { %749 = vrot.lane.b32.xlu2 %v741_v45, %s2320_s18  ;;  %v2322_v45 = vmov 0.0|0.0  }
 0x351   :  { %v661_v46 = vpop.f32.mrf.mxu3 }
 0x352   :  { %v662_v48 = vadd.f32 %v2305_v41, %v661_v46 }
 0x354   :  { %v670_v49 = vmax.f32 %v662_v48, 0.0 }
 0x356   :  { %v686_v53 = vrot.slane %v670_v49, 4  ;;  %v706_v54 = vrot.slane %v670_v49, 6  ;;  %v742_v29 = vpack.c.bf16 %v670_v49, %v670_v49 }
 0x358   :  { %v691_v56 = vsel %vm516_vm11, %v685_v50, %v686_v53  ;;  %v711_v57 = vsel %vm106_vm3, %v705_v52, %v706_v54 }
 0x359   :  { %v698_v6 = vpack.c.bf16 %v691_v56, %v691_v56  ;;  %v664_v17 = vpop.f32.mrf.mxu3  ;;  %v718_v58 = vpack.c.bf16 %v711_v57, %v711_v57 }
 0x35a   :  { %v665_v59 = vadd.f32 %v2305_v41, %v664_v17 }
 0x35b   :  { %702 = vst.msk [vmem:[#allocation2 + $0x4] sm:$0xf] %vm119_vm5, %v698_v6  ;;  %727 = vrot.lane.b32.xlu1 %v718_v58, %s2321_s23 }
 0x35c   :  { %v671_v61 = vmax.f32 %v665_v59, 0.0 }
 0x35e   :  { %v687_v62 = vrot.slane %v671_v61, 4  ;;  %v707_v63 = vrot.slane %v671_v61, 6  ;;  %v743_v31 = vpack.c.bf16 %v671_v61, %v671_v61 }
 0x360   :  { %v690_v0 = vsel %vm516_vm11, %v686_v53, %v687_v62  ;;  %v710_v1 = vsel %vm106_vm3, %v706_v54, %v707_v63  ;;  %v2306_v54 = vld [vmem:[%s3059_s2 + $0x9] ss:$0 sm:$0xff] }
 0x361   :  { %v695_v2 = vsel %vm78_vm12, %v690_v0, 0.0  ;;  %v666_v27 = vpop.f32.mrf.mxu3  ;;  %v715_v4 = vsel %vm74_vm6, %v710_v1, 0.0 }
 0x362   :  { %v699_v25 = vpack.c.bf16 %v695_v2, %v695_v2  ;;  %v667_v5 = vadd.f32 %v2305_v41, %v666_v27  ;;  %v719_v7 = vpack.c.bf16 %v715_v4, %v715_v4 }
 0x364   :  { %703 = vst.msk [vmem:[#allocation2 + $0x8] sm:$0xf] %vm119_vm5, %v699_v25  ;;  %v672_v9 = vmax.f32 %v667_v5, 0.0  ;;  %729 = vrot.lane.b32.xlu1 %v719_v7, %s2321_s23 }
 0x366   :  { %v688_v10 = vrot.slane %v672_v9, 4  ;;  %v708_v11 = vrot.slane %v672_v9, 6  ;;  %v744_v28 = vpack.c.bf16 %v672_v9, %v672_v9 }
 0x368   :  { %v689_v12 = vsel %vm516_vm11, %v687_v62, %v688_v10  ;;  %v692_v13 = vsel %vm516_vm11, %v688_v10, %v685_v50  ;;  %v709_v14 = vsel %vm106_vm3, %v707_v63, %v708_v11  ;;  %v712_v15 = vsel %vm106_vm3, %v708_v11, %v705_v52 }
 0x369   :  { %v693_v16 = vsel %vm76_vm13, %v692_v13, 0.0  ;;  %v700_v19 = vpack.c.bf16 %v689_v12, %v689_v12  ;;  %v720_v20 = vpack.c.bf16 %v709_v14, %v709_v14  ;;  %v713_v21 = vsel %vm72_vm4, %v712_v15, 0.0 }
 0x36a   :  { %v697_v22 = vpack.c.bf16 %v693_v16, %v693_v16  ;;  %v717_v24 = vpack.c.bf16 %v713_v21, %v713_v21 }
 0x36b   :  { %704 = vst.msk [vmem:[#allocation2 + $0xc] sm:$0xf] %vm119_vm5, %v700_v19  ;;  %731 = vrot.lane.b32.xlu2 %v720_v20, %s2321_s23 }
 0x36c   :  { %701 = vst.msk [vmem:[#allocation2] sm:$0xf] %vm119_vm5, %v697_v22  ;;  %725 = vrot.lane.b32.xlu0 %v717_v24, %s2321_s23  ;;  %755 = vrot.lane.b32.xlu1 %v744_v28, %s2320_s18 }
 0x374   :  { %751 = vrot.lane.b32.xlu0 %v742_v29, %s2320_s18 }
 0x37c   :  { %753 = vrot.lane.b32.xlu0 %v743_v31, %s2320_s18 }
 0x3aa   :  { %v750_v36 = vpop.permute.xlu2 %749 }
 0x3c5   :  { %v732_v38 = vpop.permute.xlu2 %731 }
 0x3c6   :  { %740 = vst.msk [vmem:[#allocation2 + $0xc] sm:$0xf] %vm157_vm7, %v732_v38  ;;  %v2256_v38 = vld [vmem:[%s3058_s1 + $0x68] sm:$0xff] }
 0x3cd   :  { %v728_v41 = vpop.permute.xlu1 %727 }
 0x3ce   :  { %738 = vst.msk [vmem:[#allocation2 + $0x4] sm:$0xf] %vm157_vm7, %v728_v41 }
 0x3d6   :  { %v730_v42 = vpop.permute.xlu1 %729 }
 0x3d7   :  { %739 = vst.msk [vmem:[#allocation2 + $0x8] sm:$0xf] %vm157_vm7, %v730_v42 }
 0x3de   :  { %v726_v43 = vpop.permute.xlu0 %725  ;;  %v756_v44 = vpop.permute.xlu1 %755 }
 0x3df   :  { %737 = vst.msk [vmem:[#allocation2] sm:$0xf] %vm157_vm7, %v726_v43 }
 0x3e0   :  { %761 = vst.msk [vmem:[#allocation2] sm:$0xf] %vm182_vm8, %v750_v36  ;;  %v2258_v36 = vld [vmem:[%s3058_s1 + $0x78] sm:$0xff] }
 0x3e1   :  { %764 = vst.msk [vmem:[#allocation2 + $0xc] sm:$0xf] %vm182_vm8, %v756_v44 }
 0x3e2   :  { %877 = vst.msk [vmem:[#allocation2] sm:$0xf] %vm119_vm5, %v2322_v45 }
 0x3e6   :  { %v752_v46 = vpop.permute.xlu0 %751 }
 0x3e7   :  { %762 = vst.msk [vmem:[#allocation2 + $0x4] sm:$0xf] %vm182_vm8, %v752_v46 }
 0x3e8   :  { %v2254_v52 = vld [vmem:[#allocation2 + $0x8] sm:$0xf0] }
 0x3ee   :  { %v754_v48 = vpop.permute.xlu0 %753  ;;  %v2253_v49 = vld [vmem:[#allocation2] sm:$0xff] }
 0x3ef   :  { %763 = vst.msk [vmem:[#allocation2 + $0x8] sm:$0xf] %vm182_vm8, %v754_v48  ;;  %2019 = vmatmul.msk.bf16.vlgmr.msrb.gmra.mxu2 %vm238_vm9, %v2253_v49 }
 0x3f6   :  { %v1993_v50 = vld [vmem:[#allocation2 + $0x8] sm:$0xf] }
 0x3f7   :  { %879 = vst.msk [vmem:[#allocation2 + $0x8] sm:$0xf] %vm119_vm5, %v2322_v45  ;;  %v1994_v53 = vor.u32 %v2254_v52, %v1993_v50 }
 0x3ff   :  { %2020 = vmatmul.msk.bf16.gmra.mxu2 %vm238_vm9, %v1994_v53  ;;  %v2307_v53 = vld [vmem:[%s3059_s2 + $0x2] ss:$0 sm:$0xff] }
 0x472   :  { %v831_v56 = vpop.f32.mrf.mxu2 }
 0x473   :  { %v832_v57 = vadd.f32 %v2306_v54, %v831_v56 }
 0x475   :  { %v841_v6 = vmax.f32 %v832_v57, 0.0 }
 0x477   :  { %v847_v17 = vadd.f32 %v841_v6, %v2536_v23 }
 0x479   :  { %v2712_v58 = vmax.f32 %v847_v17, 0.0 }
 0x47a   :  { %v833_v59 = vpop.f32.mrf.mxu2 }
 0x47b   :  { %v2714_v61 = vadd.f32 %v2306_v54, %v833_v59  ;;  %v874_v62 = vpack.c.bf16 %v2712_v58, %v2712_v58  ;;  %v881_v2 = vrot.slane %v2712_v58, 4 }
 0x47d   :  { %v842_v63 = vmax.f32 %v2714_v61, 0.0  ;;  %925 = vrot.lane.b32.xlu1 %v874_v62, %s2320_s18  ;;  %878 = vst.msk [vmem:[#allocation2 + $0x4] sm:$0xf] %vm119_vm5, %v874_v62 }
 0x47f   :  { %v848_v0 = vadd.f32 %v842_v63, %v2546_v33  ;;  %v2260_v33 = vld [vmem:[%s3058_s1 + $0x88] sm:$0xff] }
 0x480   :  { %1000 = vmatpush.bf16.msrb.mxu0 %v2260_v33 }
 0x481   :  { %v2724_v1 = vmax.f32 %v848_v0, 0.0 }
 0x482   :  { %v836_v23 = vpop.f32.mrf.mxu2 }
 0x483   :  { %v882_v27 = vrot.slane %v2724_v1, 4  ;;  %v837_v4 = vadd.f32 %v2306_v54, %v836_v23  ;;  %v918_v35 = vpack.c.bf16 %v2724_v1, %v2724_v1 }
 0x485   :  { %v843_v25 = vmax.f32 %v837_v4, 0.0  ;;  %v887_v5 = vsel %vm516_vm11, %v881_v2, %v882_v27 }
 0x486   :  { %v894_v7 = vpack.c.bf16 %v887_v5, %v887_v5 }
 0x487   :  { %v849_v9 = vadd.f32 %v843_v25, %v2559_v47  ;;  %v2259_v47 = vld [vmem:[%s3058_s1 + $0x80] sm:$0xff] }
 0x488   :  { %903 = vrot.lane.b32.xlu0 %v894_v7, %s2321_s23  ;;  %1001 = vmatpush.bf16.msrb.mxu0 %v2259_v47 }
 0x489   :  { %v2732_v10 = vmax.f32 %v849_v9, 0.0 }
 0x48a   :  { %v838_v11 = vpop.f32.mrf.mxu2 }
 0x48b   :  { %v883_v12 = vrot.slane %v2732_v10, 4  ;;  %v2738_v13 = vadd.f32 %v2306_v54, %v838_v11  ;;  %v876_v14 = vpack.c.bf16 %v2732_v10, %v2732_v10 }
 0x48c   :  { %1002 = vmatpush.bf16.msrb.mxu0 %v2258_v36  ;;  %v2264_v36 = vld [vmem:[%s3058_s1 + $0x1e8] sm:$0xff] }
 0x48d   :  { %v844_v15 = vmax.f32 %v2738_v13, 0.0  ;;  %v886_v16 = vsel %vm516_vm11, %v882_v27, %v883_v12  ;;  %880 = vst.msk [vmem:[#allocation2 + $0xc] sm:$0xf] %vm119_vm5, %v876_v14  ;;  %v2271_v13 = vld [vmem:[%s3058_s1 + $0xa0] sm:$0xff] }
 0x48e   :  { %v891_v19 = vsel %vm78_vm12, %v886_v16, 0.0 }
 0x48f   :  { %v850_v20 = vadd.f32 %v844_v15, %v2578_v60  ;;  %v895_v21 = vpack.c.bf16 %v891_v19, %v891_v19 }
 0x490   :  { %1003 = vmatpush.bf16.msrb.mxu0 %v2257_v37  ;;  %v2263_v37 = vld [vmem:[%s3058_s1 + $0x1e0] sm:$0xff] }
 0x491   :  { %v2754_v22 = vmax.f32 %v850_v20, 0.0  ;;  %905 = vrot.lane.b32.xlu0 %v895_v21, %s2321_s23 }
 0x493   :  { %v884_v24 = vrot.slane %v2754_v22, 4  ;;  %v920_v60 = vpack.c.bf16 %v2754_v22, %v2754_v22 }
 0x494   :  { %1004 = vmatpush.bf16.msrb.mxu0 %v2256_v38 }
 0x495   :  { %v885_v28 = vsel %vm516_vm11, %v883_v12, %v884_v24  ;;  %v888_v29 = vsel %vm516_vm11, %v884_v24, %v881_v2 }
 0x496   :  { %v896_v31 = vpack.c.bf16 %v885_v28, %v885_v28  ;;  %v889_v32 = vsel %vm76_vm13, %v888_v29, 0.0 }
 0x497   :  { %v893_v34 = vpack.c.bf16 %v889_v32, %v889_v32  ;;  %v2266_v32 = vld [vmem:[%s3058_s1 + $0x1f8] sm:$0xff] }
 0x498   :  { %907 = vrot.lane.b32.xlu1 %v896_v31, %s2321_s23  ;;  %1005 = vmatpush.bf16.msrb.mxu0 %v2255_v39 }
 0x499   :  { %901 = vrot.lane.b32.xlu2 %v893_v34, %s2321_s23  ;;  %931 = vrot.lane.b32.xlu0 %v920_v60, %s2320_s18 }
 0x49a   :  { %1166 = vmatpush.bf16.msrb.mxu1 %v2266_v32 }
 0x4a1   :  { %927 = vrot.lane.b32.xlu2 %v918_v35, %s2320_s18  ;;  %v2265_v35 = vld [vmem:[%s3058_s1 + $0x1f0] sm:$0xff] }
 0x4a2   :  { %1167 = vmatpush.bf16.msrb.mxu1 %v2265_v35 }
 0x4a6   :  { %1168 = vmatpush.bf16.msrb.mxu1 %v2264_v36 }
 0x4a9   :  { %929 = vrot.lane.b32.xlu2 %v876_v14, %s2320_s18 }
 0x4aa   :  { %1169 = vmatpush.bf16.msrb.mxu1 %v2263_v37 }
 0x4ef   :  { %v926_v41 = vpop.permute.xlu1 %925 }
 0x4f3   :  { %v902_v40 = vpop.permute.xlu2 %901 }
 0x4f4   :  { %913 = vst.msk [vmem:[#allocation2] sm:$0xf] %vm157_vm7, %v902_v40 }
 0x4f5   :  { %937 = vst.msk [vmem:[#allocation2] sm:$0xf] %vm182_vm8, %v926_v41 }
 0x4f6   :  { %1041 = vst.msk [vmem:[#allocation2] sm:$0xf] %vm119_vm5, %v2322_v45 }
 0x4fa   :  { %v904_v42 = vpop.permute.xlu0 %903 }
 0x4fb   :  { %914 = vst.msk [vmem:[#allocation2 + $0x4] sm:$0xf] %vm157_vm7, %v904_v42  ;;  %v928_v43 = vpop.permute.xlu2 %927 }
 0x4fc   :  { %938 = vst.msk [vmem:[#allocation2 + $0x4] sm:$0xf] %vm182_vm8, %v928_v43 }
 0x503   :  { %v930_v44 = vpop.permute.xlu2 %929  ;;  %v906_v46 = vpop.permute.xlu0 %905  ;;  %v2261_v48 = vld [vmem:[#allocation2] sm:$0xff] }
 0x504   :  { %915 = vst.msk [vmem:[#allocation2 + $0x8] sm:$0xf] %vm157_vm7, %v906_v46  ;;  %2053 = vmatmul.msk.bf16.vlgmr.msrb.gmra.mxu0 %vm238_vm9, %v2261_v48  ;;  %v2308_v48 = vld [vmem:[%s3059_s2 + $0xa] ss:$0 sm:$0xff] }
 0x505   :  { %939 = vst.msk [vmem:[#allocation2 + $0x8] sm:$0xf] %vm182_vm8, %v930_v44 }
 0x506   :  { %1043 = vst.msk [vmem:[#allocation2 + $0x8] sm:$0xf] %vm119_vm5, %v2322_v45 }
 0x50a   :  { %v908_v49 = vpop.permute.xlu1 %907 }
 0x50b   :  { %916 = vst.msk [vmem:[#allocation2 + $0xc] sm:$0xf] %vm157_vm7, %v908_v49  ;;  %v932_v50 = vpop.permute.xlu0 %931 }
 0x50c   :  { %940 = vst.msk [vmem:[#allocation2 + $0xc] sm:$0xf] %vm182_vm8, %v932_v50 }
 0x513   :  { %v2262_v52 = vld [vmem:[#allocation2 + $0x8] sm:$0xff] }
 0x514   :  { %2054 = vmatmul.msk.bf16.gmra.mxu0 %vm238_vm9, %v2262_v52 }
 0x581   :  { %v1007_v54 = vpop.f32.mrf.mxu0 }
 0x582   :  { %v1008_v56 = vadd.f32 %v2307_v53, %v1007_v54 }
 0x584   :  { %v1017_v57 = vmax.f32 %v1008_v56, 0.0 }
 0x586   :  { %v1038_v6 = vpack.c.bf16 %v1017_v57, %v1017_v57  ;;  %v1045_v0 = vrot.slane %v1017_v57, 4 }
 0x588   :  { %1042 = vst.msk [vmem:[#allocation2 + $0x4] sm:$0xf] %vm119_vm5, %v1038_v6  ;;  %1089 = vrot.lane.b32.xlu0 %v1038_v6, %s2320_s18 }
 0x589   :  { %v1009_v17 = vpop.f32.mrf.mxu0 }
 0x58a   :  { %v1010_v59 = vadd.f32 %v2307_v53, %v1009_v17 }
 0x58c   :  { %v1018_v62 = vmax.f32 %v1010_v59, 0.0  ;;  %v845_v59 = vadd.f32 %v842_v63, %v437_v30 }
 0x58e   :  { %v1046_v23 = vrot.slane %v1018_v62, 4  ;;  %v1082_v18 = vpack.c.bf16 %v1018_v62, %v1018_v62 }
 0x590   :  { %v1051_v2 = vsel %vm516_vm11, %v1045_v0, %v1046_v23 }
 0x591   :  { %v1012_v27 = vpop.f32.mrf.mxu0  ;;  %v1058_v4 = vpack.c.bf16 %v1051_v2, %v1051_v2 }
 0x592   :  { %v1013_v25 = vadd.f32 %v2307_v53, %v1012_v27 }
 0x593   :  { %1067 = vrot.lane.b32.xlu2 %v1058_v4, %s2321_s23 }
 0x594   :  { %v1019_v5 = vmax.f32 %v1013_v25, 0.0 }
 0x596   :  { %v1040_v7 = vpack.c.bf16 %v1019_v5, %v1019_v5  ;;  %v1047_v9 = vrot.slane %v1019_v5, 4 }
 0x598   :  { %1044 = vst.msk [vmem:[#allocation2 + $0xc] sm:$0xf] %vm119_vm5, %v1040_v7  ;;  %v1050_v33 = vsel %vm516_vm11, %v1046_v23, %v1047_v9 }
 0x599   :  { %v1014_v11 = vpop.f32.mrf.mxu0  ;;  %v1055_v12 = vsel %vm78_vm12, %v1050_v33, 0.0 }
 0x59a   :  { %v1015_v14 = vadd.f32 %v2307_v53, %v1014_v11  ;;  %v1059_v47 = vpack.c.bf16 %v1055_v12, %v1055_v12  ;;  %v2274_v53 = vld [vmem:[%s3058_s1 + $0xb8] sm:$0xff] }
 0x59b   :  { %1291 = vmatpush.bf16.msrb.mxu3 %v2274_v53  ;;  %v2310_v53 = vld [vmem:[%s3059_s2 + $0xb] ss:$0 sm:$0xff] }
 0x59c   :  { %v1020_v16 = vmax.f32 %v1015_v14, 0.0  ;;  %1069 = vrot.lane.b32.xlu2 %v1059_v47, %s2321_s23 }
 0x59e   :  { %v1048_v19 = vrot.slane %v1020_v16, 4  ;;  %v1084_v29 = vpack.c.bf16 %v1020_v16, %v1020_v16 }
 0x59f   :  { %1292 = vmatpush.bf16.msrb.mxu3 %v2273_v51 }
 0x5a0   :  { %v1049_v20 = vsel %vm516_vm11, %v1047_v9, %v1048_v19  ;;  %v1052_v21 = vsel %vm516_vm11, %v1048_v19, %v1045_v0  ;;  %v2309_v19 = vld [vmem:[%s3059_s2 + $0x3] ss:$0 sm:$0xff] }
 0x5a1   :  { %v1060_v24 = vpack.c.bf16 %v1049_v20, %v1049_v20  ;;  %v1053_v28 = vsel %vm76_vm13, %v1052_v21, 0.0 }
 0x5a2   :  { %v1057_v31 = vpack.c.bf16 %v1053_v28, %v1053_v28 }
 0x5a3   :  { %1071 = vrot.lane.b32.xlu0 %v1060_v24, %s2321_s23 }
 0x5a4   :  { %1065 = vrot.lane.b32.xlu1 %v1057_v31, %s2321_s23  ;;  %1095 = vrot.lane.b32.xlu2 %v1084_v29, %s2320_s18 }
 0x5ac   :  { %1091 = vrot.lane.b32.xlu1 %v1082_v18, %s2320_s18 }
 0x5b4   :  { %1093 = vrot.lane.b32.xlu1 %v1040_v7, %s2320_s18 }
 0x5ed   :  { %v1068_v34 = vpop.permute.xlu2 %1067 }
 0x5ee   :  { %1078 = vst.msk [vmem:[#allocation2 + $0x4] sm:$0xf] %vm157_vm7, %v1068_v34 }
 0x5f6   :  { %v1070_v60 = vpop.permute.xlu2 %1069 }
 0x5f7   :  { %1079 = vst.msk [vmem:[#allocation2 + $0x8] sm:$0xf] %vm157_vm7, %v1070_v60 }
 0x5fa   :  { %v1090_v38 = vpop.permute.xlu0 %1089 }
 0x5fe   :  { %v1096_v40 = vpop.permute.xlu2 %1095 }
 0x615   :  { %v1072_v39 = vpop.permute.xlu0 %1071 }
 0x616   :  { %1080 = vst.msk [vmem:[#allocation2 + $0xc] sm:$0xf] %vm157_vm7, %v1072_v39  ;;  %v1066_v41 = vpop.permute.xlu1 %1065  ;;  %v2279_v39 = vld [vmem:[%s3058_s1 + $0x230] sm:$0xff] }
 0x617   :  { %1104 = vst.msk [vmem:[#allocation2 + $0xc] sm:$0xf] %vm182_vm8, %v1096_v40  ;;  %v2278_v40 = vld [vmem:[%s3058_s1 + $0x228] sm:$0xff] }
 0x618   :  { %1077 = vst.msk [vmem:[#allocation2] sm:$0xf] %vm157_vm7, %v1066_v41  ;;  %v2277_v41 = vld [vmem:[%s3058_s1 + $0x220] sm:$0xff] }
 0x619   :  { %1101 = vst.msk [vmem:[#allocation2] sm:$0xf] %vm182_vm8, %v1090_v38  ;;  %v2280_v38 = vld [vmem:[%s3058_s1 + $0x238] sm:$0xff] }
 0x61a   :  { %1213 = vst.msk [vmem:[#allocation2] sm:$0xf] %vm119_vm5, %v2322_v45  ;;  %1403 = vmatpush.bf16.msra.mxu2 %v2280_v38  ;;  %v2290_v38 = vld [vmem:[%s3058_s1 + $0x298] sm:$0xff] }
 0x61e   :  { %v1092_v42 = vpop.permute.xlu1 %1091  ;;  %1404 = vmatpush.bf16.msra.mxu2 %v2279_v39 }
 0x61f   :  { %1102 = vst.msk [vmem:[#allocation2 + $0x4] sm:$0xf] %vm182_vm8, %v1092_v42 }
 0x622   :  { %1405 = vmatpush.bf16.msra.mxu2 %v2278_v40 }
 0x626   :  { %v1094_v43 = vpop.permute.xlu1 %1093  ;;  %v2269_v44 = vld [vmem:[#allocation2] sm:$0xff]  ;;  %1406 = vmatpush.bf16.msra.mxu2 %v2277_v41 }
 0x627   :  { %1103 = vst.msk [vmem:[#allocation2 + $0x8] sm:$0xf] %vm182_vm8, %v1094_v43  ;;  %2087 = vmatmul.msk.bf16.vlgmr.msrb.gmra.mxu1 %vm238_vm9, %v2269_v44  ;;  %v2284_v44 = vld [vmem:[%s3058_s1 + $0xe8] sm:$0xff] }
 0x628   :  { %1215 = vst.msk [vmem:[#allocation2 + $0x8] sm:$0xf] %vm119_vm5, %v2322_v45  ;;  %1465 = vmatpush.bf16.msra.mxu0 %v2284_v44 }
 0x62a   :  { %1621 = vmatpush.bf16.msrb.mxu2 %v2290_v38  ;;  %v2315_v38 = vld [vmem:[%s3059_s2 + $0x6] ss:$0 sm:$0xff] }
 0x62f   :  { %v2270_v46 = vld [vmem:[#allocation2 + $0x8] sm:$0xff] }
 0x637   :  { %2088 = vmatmul.msk.bf16.gmra.mxu1 %vm238_vm9, %v2270_v46 }
 0x6a4   :  { %v1171_v49 = vpop.f32.mrf.mxu1 }
 0x6a5   :  { %v1172_v50 = vadd.f32 %v2308_v48, %v1171_v49 }
 0x6a7   :  { %v1181_v52 = vmax.f32 %v1172_v50, 0.0 }
 0x6a9   :  { %v1187_v54 = vadd.f32 %v1181_v52, %v2712_v58  ;;  %v2283_v52 = vld [vmem:[%s3058_s1 + $0xe0] sm:$0xff] }
 0x6aa   :  { %1466 = vmatpush.bf16.msra.mxu0 %v2283_v52 }
 0x6ab   :  { %v2863_v56 = vmax.f32 %v1187_v54, 0.0 }
 0x6ac   :  { %v1173_v57 = vpop.f32.mrf.mxu1 }
 0x6ad   :  { %v1174_v6 = vadd.f32 %v2308_v48, %v1173_v57  ;;  %v1210_v17 = vpack.c.bf16 %v2863_v56, %v2863_v56 }
 0x6af   :  { %v1182_v62 = vmax.f32 %v1174_v6, 0.0  ;;  %1225 = vrot.lane.b32.xlu0 %v1210_v17, %s2321_s23  ;;  %1214 = vst.msk [vmem:[#allocation2 + $0x4] sm:$0xf] %vm119_vm5, %v1210_v17 }
 0x6b1   :  { %v2873_v0 = vadd.f32 %v1182_v62, %v845_v59  ;;  %v1188_v58 = vadd.f32 %v1182_v62, %v2724_v1  ;;  %v846_v1 = vadd.f32 %v844_v15, %v439_v55  ;;  %v2272_v55 = vld [vmem:[%s3058_s1 + $0xa8] sm:$0xff] }
 0x6b2   :  { %1293 = vmatpush.bf16.msrb.mxu3 %v2272_v55 }
 0x6b3   :  { %v2876_v23 = vmax.f32 %v1188_v58, 0.0 }
 0x6b4   :  { %v1176_v2 = vpop.f32.mrf.mxu1 }
 0x6b5   :  { %v1177_v27 = vadd.f32 %v2308_v48, %v1176_v2  ;;  %v1218_v4 = vpack.c.bf16 %v2876_v23, %v2876_v23  ;;  %v2286_v2 = vld [vmem:[%s3058_s1 + $0x268] sm:$0xff] }
 0x6b6   :  { %1294 = vmatpush.bf16.msrb.mxu3 %v2271_v13  ;;  %1513 = vmatpush.bf16.msra.mxu1 %v2286_v2  ;;  %v2313_v2 = vld [vmem:[%s3059_s2 + $0x5] ss:$0 sm:$0xff] }
 0x6b7   :  { %v1183_v26 = vmax.f32 %v1177_v27, 0.0  ;;  %1227 = vrot.lane.b32.xlu1 %v1218_v4, %s2321_s23 }
 0x6b9   :  { %v1189_v30 = vadd.f32 %v1183_v26, %v2732_v10 }
 0x6bb   :  { %v2882_v61 = vmax.f32 %v1189_v30, 0.0 }
 0x6bc   :  { %v1178_v63 = vpop.f32.mrf.mxu1 }
 0x6bd   :  { %v1179_v25 = vadd.f32 %v2308_v48, %v1178_v63  ;;  %v1212_v5 = vpack.c.bf16 %v2882_v61, %v2882_v61 }
 0x6bf   :  { %v1184_v7 = vmax.f32 %v1179_v25, 0.0  ;;  %1229 = vrot.lane.b32.xlu2 %v1212_v5, %s2321_s23  ;;  %1216 = vst.msk [vmem:[#allocation2 + $0xc] sm:$0xf] %vm119_vm5, %v1212_v5 }
 0x6c1   :  { %v2892_v9 = vadd.f32 %v1184_v7, %v846_v1  ;;  %v1190_v10 = vadd.f32 %v1184_v7, %v2754_v22 }
 0x6c3   :  { %v2895_v33 = vmax.f32 %v1190_v10, 0.0 }
 0x6c5   :  { %v1220_v11 = vpack.c.bf16 %v2895_v33, %v2895_v33 }
 0x6c7   :  { %1231 = vrot.lane.b32.xlu0 %v1220_v11, %s2321_s23 }
 0x719   :  { %v1230_v15 = vpop.permute.xlu2 %1229 }
 0x71a   :  { %1239 = vst.msk [vmem:[#allocation2 + $0x8] sm:$0xf] %vm157_vm7, %v1230_v15  ;;  %v2285_v15 = vld [vmem:[%s3058_s1 + $0x260] sm:$0xff] }
 0x71b   :  { %1328 = vst.msk [vmem:[#allocation2 + $0x8] sm:$0xf] %vm119_vm5, %v2322_v45  ;;  %1514 = vmatpush.bf16.msra.mxu1 %v2285_v15 }
 0x721   :  { %v1226_v22 = vpop.permute.xlu0 %1225 }
 0x722   :  { %1237 = vst.msk [vmem:[#allocation2] sm:$0xf] %vm157_vm7, %v1226_v22 }
 0x723   :  { %1326 = vst.msk [vmem:[#allocation2] sm:$0xf] %vm119_vm5, %v2322_v45 }
 0x729   :  { %v1228_v12 = vpop.permute.xlu1 %1227 }
 0x72a   :  { %1238 = vst.msk [vmem:[#allocation2 + $0x4] sm:$0xf] %vm157_vm7, %v1228_v12 }
 0x731   :  { %v2275_v14 = vld [vmem:[#allocation2] sm:$0xff] }
 0x732   :  { %2113 = vmatmul.msk.bf16.vlgmr.msrb.gmra.mxu3 %vm1280_vm14, %v2275_v14 }
 0x739   :  { %v1232_v47 = vpop.permute.xlu0 %1231 }
 0x73a   :  { %1240 = vst.msk [vmem:[#allocation2 + $0xc] sm:$0xf] %vm157_vm7, %v1232_v47 }
 0x741   :  { %v2276_v16 = vld [vmem:[#allocation2 + $0x8] sm:$0xff] }
 0x742   :  { %2114 = vmatmul.msk.bf16.gmra.mxu3 %vm1280_vm14, %v2276_v16 }
 0x7b5   :  { %v1296_v20 = vpop.f32.mrf.mxu3 }
 0x7b6   :  { %v1297_v21 = vadd.f32 %v2309_v19, %v1296_v20 }
 0x7b8   :  { %v1306_v45 = vmax.f32 %v1297_v21, 0.0 }
 0x7ba   :  { %v1323_v24 = vpack.c.bf16 %v1306_v45, %v1306_v45 }
 0x7bc   :  { %1327 = vst.msk [vmem:[#allocation2 + $0x4] sm:$0xf] %vm119_vm5, %v1323_v24  ;;  %1338 = vrot.lane.b32.xlu1 %v1323_v24, %s2321_s23 }
 0x7bd   :  { %v1298_v28 = vpop.f32.mrf.mxu3 }
 0x7be   :  { %v1299_v29 = vadd.f32 %v2309_v19, %v1298_v28 }
 0x7c0   :  { %v1307_v31 = vmax.f32 %v1299_v29, 0.0 }
 0x7c2   :  { %v1331_v18 = vpack.c.bf16 %v1307_v31, %v1307_v31 }
 0x7c4   :  { %1340 = vrot.lane.b32.xlu2 %v1331_v18, %s2321_s23  ;;  %v2287_v18 = vld [vmem:[%s3058_s1 + $0x110] sm:$0xff] }
 0x7c5   :  { %v1301_v3 = vpop.f32.mrf.mxu3 }
 0x7c6   :  { %v1302_v8 = vadd.f32 %v2309_v19, %v1301_v3  ;;  %v2312_v3 = vld [vmem:[%s3059_s2 + $0xc] ss:$0 sm:$0xff] }
 0x7c8   :  { %v1308_v32 = vmax.f32 %v1302_v8, 0.0 }
 0x7ca   :  { %v1325_v34 = vpack.c.bf16 %v1308_v32, %v1308_v32 }
 0x7cc   :  { %1329 = vst.msk [vmem:[#allocation2 + $0xc] sm:$0xf] %vm119_vm5, %v1325_v34  ;;  %1342 = vrot.lane.b32.xlu0 %v1325_v34, %s2321_s23 }
 0x7cd   :  { %v1303_v60 = vpop.f32.mrf.mxu3 }
 0x7ce   :  { %v1304_v35 = vadd.f32 %v2309_v19, %v1303_v60 }
 0x7d0   :  { %v1309_v36 = vmax.f32 %v1304_v35, 0.0 }
 0x7d2   :  { %v1333_v37 = vpack.c.bf16 %v1309_v36, %v1309_v36 }
 0x7d4   :  { %1344 = vrot.lane.b32.xlu1 %v1333_v37, %s2321_s23 }
 0x81e   :  { %v1341_v42 = vpop.permute.xlu2 %1340 }
 0x81f   :  { %1351 = vst.msk [vmem:[#allocation2 + $0x4] sm:$0xf] %vm157_vm7, %v1341_v42 }
 0x82e   :  { %v1339_v43 = vpop.permute.xlu1 %1338 }
 0x82f   :  { %1350 = vst.msk [vmem:[#allocation2] sm:$0xf] %vm157_vm7, %v1339_v43 }
 0x836   :  { %v2281_v46 = vld [vmem:[#allocation2] sm:$0xff] }
 0x837   :  { %2139 = vmatmul.msk.bf16.vlgmr.msra.gmra.mxu2 %vm1280_vm14, %v2281_v46 }
 0x83e   :  { %v1343_v48 = vpop.permute.xlu0 %1342 }
 0x83f   :  { %1352 = vst.msk [vmem:[#allocation2 + $0x8] sm:$0xf] %vm157_vm7, %v1343_v48 }
 0x846   :  { %v1345_v49 = vpop.permute.xlu1 %1344 }
 0x847   :  { %1353 = vst.msk [vmem:[#allocation2 + $0xc] sm:$0xf] %vm157_vm7, %v1345_v49 }
 0x84e   :  { %v2282_v50 = vld [vmem:[#allocation2 + $0x8] sm:$0xff] }
 0x84f   :  { %2140 = vmatmul.msk.bf16.gmra.mxu2 %vm1280_vm14, %v2282_v50 }
 0x8ba   :  { %v1408_v54 = vpop.f32.mrf.mxu2 }
 0x8bb   :  { %v1409_v57 = vadd.f32 %v2310_v53, %v1408_v54 }
 0x8bd   :  { %v1418_v6 = vmax.f32 %v1409_v57, 0.0 }
 0x8bf   :  { %v1424_v62 = vadd.f32 %v1418_v6, %v2863_v56 }
 0x8c1   :  { %v1428_v26 = vmax.f32 %v1424_v62, 0.0  ;;  %v2289_v62 = vld [vmem:[%s3058_s1 + $0x290] sm:$0xff] }
 0x8c2   :  { %v1410_v17 = vpop.f32.mrf.mxu2  ;;  %1622 = vmatpush.bf16.msrb.mxu2 %v2289_v62 }
 0x8c3   :  { %v1411_v59 = vadd.f32 %v2310_v53, %v1410_v17 }
 0x8c5   :  { %v1419_v58 = vmax.f32 %v1411_v59, 0.0 }
 0x8c7   :  { %v1422_v27 = vadd.f32 %v1419_v58, %v2873_v0  ;;  %v1425_v4 = vadd.f32 %v1419_v58, %v2876_v23 }
 0x8c9   :  { %v1429_v30 = vmax.f32 %v1425_v4, 0.0  ;;  %v2292_v4 = vld [vmem:[%s3058_s1 + $0x148] sm:$0xff] }
 0x8ca   :  { %1681 = vmatpush.bf16.msrb.mxu0 %v2292_v4 }
 0x8cb   :  { %v1438_v63 = vpack.c.bf16 %v1429_v30, %v1428_v26 }
 0x8cd   :  { %2149 = vmatmul.msk.bf16.vlgmr.msra.gmra.mxu0 %vm464_vm10, %v1438_v63 }
 0x8d2   :  { %v1413_v25 = vpop.f32.mrf.mxu2 }
 0x8d3   :  { %v1414_v5 = vadd.f32 %v2310_v53, %v1413_v25 }
 0x8d5   :  { %v1420_v1 = vmax.f32 %v1414_v5, 0.0 }
 0x8d7   :  { %v1426_v10 = vadd.f32 %v1420_v1, %v2882_v61  ;;  %v2311_v61 = vld [vmem:[%s3059_s2 + $0x4] ss:$0 sm:$0xff] }
 0x8d9   :  { %v1430_v55 = vmax.f32 %v1426_v10, 0.0 }
 0x8da   :  { %v1415_v7 = vpop.f32.mrf.mxu2 }
 0x8db   :  { %v1416_v56 = vadd.f32 %v2310_v53, %v1415_v7 }
 0x8dd   :  { %v1421_v11 = vmax.f32 %v1416_v56, 0.0 }
 0x8df   :  { %v1423_v51 = vadd.f32 %v1421_v11, %v2892_v9  ;;  %v1427_v0 = vadd.f32 %v1421_v11, %v2895_v33  ;;  %v2288_v9 = vld [vmem:[%s3058_s1 + $0x118] sm:$0xff] }
 0x8e0   :  { %1573 = vmatpush.bf16.msra.mxu3 %v2288_v9 }
 0x8e1   :  { %v1431_v23 = vmax.f32 %v1427_v0, 0.0 }
 0x8e3   :  { %v1439_v13 = vpack.c.bf16 %v1431_v23, %v1430_v55 }
 0x8e4   :  { %1574 = vmatpush.bf16.msra.mxu3 %v2287_v18 }
 0x8e5   :  { %2150 = vmatmul.msk.bf16.gmra.mxu0 %vm464_vm10, %v1439_v13 }
 0x94a   :  { %v1468_v22 = vpop.f32.mrf.mxu0 }
 0x94b   :  { %v1469_v12 = vadd.f32 %v2311_v61, %v1468_v22 }
 0x94d   :  { %v1478_v47 = vmax.f32 %v1469_v12, 0.0 }
 0x952   :  { %v1470_v33 = vpop.f32.mrf.mxu0 }
 0x953   :  { %v1471_v14 = vadd.f32 %v2311_v61, %v1470_v33 }
 0x955   :  { %v1479_v16 = vmax.f32 %v1471_v14, 0.0  ;;  %v2294_v14 = vld [vmem:[%s3058_s1 + $0x2c8] sm:$0xff] }
 0x956   :  { %1729 = vmatpush.bf16.msrb.mxu1 %v2294_v14  ;;  %v2317_v14 = vld [vmem:[%s3059_s2 + $0x7] ss:$0 sm:$0xff] }
 0x957   :  { %v1486_v19 = vpack.c.bf16 %v1479_v16, %v1478_v47 }
 0x959   :  { %2159 = vmatmul.msk.bf16.vlgmr.msra.gmra.mxu1 %vm464_vm10, %v1486_v19 }
 0x962   :  { %v1473_v20 = vpop.f32.mrf.mxu0 }
 0x963   :  { %v1474_v21 = vadd.f32 %v2311_v61, %v1473_v20 }
 0x965   :  { %v1480_v28 = vmax.f32 %v1474_v21, 0.0 }
 0x96a   :  { %v1475_v45 = vpop.f32.mrf.mxu0 }
 0x96b   :  { %v1476_v24 = vadd.f32 %v2311_v61, %v1475_v45 }
 0x96d   :  { %v1481_v29 = vmax.f32 %v1476_v24, 0.0 }
 0x96f   :  { %v1487_v31 = vpack.c.bf16 %v1481_v29, %v1480_v28 }
 0x971   :  { %2160 = vmatmul.msk.bf16.gmra.mxu1 %vm464_vm10, %v1487_v31 }
 0x9d6   :  { %v1516_v8 = vpop.f32.mrf.mxu1 }
 0x9d7   :  { %v1517_v32 = vadd.f32 %v2312_v3, %v1516_v8 }
 0x9d9   :  { %v1526_v34 = vmax.f32 %v1517_v32, 0.0 }
 0x9db   :  { %v1532_v36 = vadd.f32 %v1526_v34, %v1428_v26 }
 0x9dd   :  { %v1536_v41 = vmax.f32 %v1532_v36, 0.0  ;;  %v2293_v36 = vld [vmem:[%s3058_s1 + $0x2c0] sm:$0xff] }
 0x9de   :  { %v1518_v60 = vpop.f32.mrf.mxu1  ;;  %1730 = vmatpush.bf16.msrb.mxu1 %v2293_v36 }
 0x9df   :  { %v1519_v35 = vadd.f32 %v2312_v3, %v1518_v60 }
 0x9e1   :  { %v1527_v37 = vmax.f32 %v1519_v35, 0.0 }
 0x9e3   :  { %v1530_v39 = vadd.f32 %v1527_v37, %v1422_v27  ;;  %v1533_v40 = vadd.f32 %v1527_v37, %v1429_v30 }
 0x9e5   :  { %v1537_v42 = vmax.f32 %v1533_v40, 0.0  ;;  %v2296_v40 = vld [vmem:[%s3058_s1 + $0x178] sm:$0xff] }
 0x9e6   :  { %1789 = vmatpush.bf16.msrb.mxu3 %v2296_v40 }
 0x9e7   :  { %v1546_v43 = vpack.c.bf16 %v1537_v42, %v1536_v41 }
 0x9e9   :  { %2169 = vmatmul.msk.bf16.vlgmr.msra.gmra.mxu3 %vm464_vm10, %v1546_v43 }
 0x9ee   :  { %v1521_v44 = vpop.f32.mrf.mxu1 }
 0x9ef   :  { %v1522_v46 = vadd.f32 %v2312_v3, %v1521_v44 }
 0x9f1   :  { %v1528_v48 = vmax.f32 %v1522_v46, 0.0 }
 0x9f3   :  { %v1534_v52 = vadd.f32 %v1528_v48, %v1430_v55  ;;  %v2291_v55 = vld [vmem:[%s3058_s1 + $0x140] sm:$0xff] }
 0x9f4   :  { %1682 = vmatpush.bf16.msrb.mxu0 %v2291_v55 }
 0x9f5   :  { %v1538_v6 = vmax.f32 %v1534_v52, 0.0 }
 0x9f6   :  { %v1523_v49 = vpop.f32.mrf.mxu1 }
 0x9f7   :  { %v1524_v50 = vadd.f32 %v2312_v3, %v1523_v49 }
 0x9f9   :  { %v1529_v53 = vmax.f32 %v1524_v50, 0.0 }
 0x9fb   :  { %v1531_v54 = vadd.f32 %v1529_v53, %v1423_v51  ;;  %v1535_v57 = vadd.f32 %v1529_v53, %v1431_v23  ;;  %v2314_v23 = vld [vmem:[%s3059_s2 + $0xd] ss:$0 sm:$0xff] }
 0x9fd   :  { %v1539_v17 = vmax.f32 %v1535_v57, 0.0 }
 0x9ff   :  { %v1547_v59 = vpack.c.bf16 %v1539_v17, %v1538_v6 }
 0xa01   :  { %2170 = vmatmul.msk.bf16.gmra.mxu3 %vm464_vm10, %v1547_v59 }
 0xa6c   :  { %v1576_v58 = vpop.f32.mrf.mxu3 }
 0xa6d   :  { %v1577_v27 = vadd.f32 %v2313_v2, %v1576_v58 }
 0xa6f   :  { %v1586_v63 = vmax.f32 %v1577_v27, 0.0 }
 0xa74   :  { %v1578_v26 = vpop.f32.mrf.mxu3 }
 0xa75   :  { %v1579_v30 = vadd.f32 %v2313_v2, %v1578_v26 }
 0xa77   :  { %v1587_v25 = vmax.f32 %v1579_v30, 0.0  ;;  %v2298_v30 = vld [vmem:[%s3058_s1 + $0x2f8] sm:$0xff] }
 0xa78   :  { %1837 = vmatpush.bf16.msra.mxu2 %v2298_v30 }
 0xa79   :  { %v1594_v5 = vpack.c.bf16 %v1587_v25, %v1586_v63 }
 0xa7b   :  { %2179 = vmatmul.msk.bf16.vlgmr.msrb.gmra.mxu2 %vm464_vm10, %v1594_v5 }
 0xa84   :  { %v1581_v1 = vpop.f32.mrf.mxu3 }
 0xa85   :  { %v1582_v7 = vadd.f32 %v2313_v2, %v1581_v1 }
 0xa87   :  { %v1588_v11 = vmax.f32 %v1582_v7, 0.0 }
 0xa8c   :  { %v1583_v56 = vpop.f32.mrf.mxu3 }
 0xa8d   :  { %v1584_v10 = vadd.f32 %v2313_v2, %v1583_v56 }
 0xa8f   :  { %v1589_v51 = vmax.f32 %v1584_v10, 0.0 }
 0xa91   :  { %v1595_v0 = vpack.c.bf16 %v1589_v51, %v1588_v11 }
 0xa93   :  { %2180 = vmatmul.msk.bf16.gmra.mxu2 %vm464_vm10, %v1595_v0 }
 0xafe   :  { %v1624_v13 = vpop.f32.mrf.mxu2 }
 0xaff   :  { %v1625_v15 = vadd.f32 %v2314_v23, %v1624_v13 }
 0xb01   :  { %v1634_v22 = vmax.f32 %v1625_v15, 0.0 }
 0xb03   :  { %v1640_v9 = vadd.f32 %v1634_v22, %v1536_v41 }
 0xb05   :  { %v1644_v19 = vmax.f32 %v1640_v9, 0.0  ;;  %v2297_v9 = vld [vmem:[%s3058_s1 + $0x2f0] sm:$0xff] }
 0xb06   :  { %v1626_v61 = vpop.f32.mrf.mxu2  ;;  %1838 = vmatpush.bf16.msra.mxu2 %v2297_v9 }
 0xb07   :  { %v1627_v12 = vadd.f32 %v2314_v23, %v1626_v61 }
 0xb09   :  { %v1635_v33 = vmax.f32 %v1627_v12, 0.0 }
 0xb0b   :  { %v1638_v47 = vadd.f32 %v1635_v33, %v1530_v39  ;;  %v1641_v16 = vadd.f32 %v1635_v33, %v1537_v42 }
 0xb0d   :  { %v1645_v20 = vmax.f32 %v1641_v16, 0.0 }
 0xb0f   :  { %v1654_v21 = vpack.c.bf16 %v1645_v20, %v1644_v19 }
 0xb11   :  { %2189 = vmatmul.msk.bf16.vlgmr.msrb.gmra.mxu0 %vm464_vm10, %v1654_v21 }
 0xb16   :  { %v1629_v45 = vpop.f32.mrf.mxu2 }
 0xb17   :  { %v1630_v24 = vadd.f32 %v2314_v23, %v1629_v45 }
 0xb19   :  { %v1636_v28 = vmax.f32 %v1630_v24, 0.0 }
 0xb1b   :  { %v1642_v18 = vadd.f32 %v1636_v28, %v1538_v6  ;;  %v2295_v6 = vld [vmem:[%s3058_s1 + $0x170] sm:$0xff] }
 0xb1c   :  { %1790 = vmatpush.bf16.msrb.mxu3 %v2295_v6 }
 0xb1d   :  { %v1646_v34 = vmax.f32 %v1642_v18, 0.0 }
 0xb1e   :  { %v1631_v29 = vpop.f32.mrf.mxu2 }
 0xb1f   :  { %v1632_v31 = vadd.f32 %v2314_v23, %v1631_v29 }
 0xb21   :  { %v1637_v3 = vmax.f32 %v1632_v31, 0.0 }
 0xb23   :  { %v1639_v8 = vadd.f32 %v1637_v3, %v1531_v54  ;;  %v1643_v32 = vadd.f32 %v1637_v3, %v1539_v17  ;;  %v2316_v17 = vld [vmem:[%s3059_s2 + $0xe] ss:$0 sm:$0xff] }
 0xb25   :  { %v1647_v60 = vmax.f32 %v1643_v32, 0.0 }
 0xb27   :  { %v1655_v35 = vpack.c.bf16 %v1647_v60, %v1646_v34 }
 0xb29   :  { %2190 = vmatmul.msk.bf16.gmra.mxu0 %vm464_vm10, %v1655_v35 }
 0xb8e   :  { %v1684_v37 = vpop.f32.mrf.mxu0 }
 0xb8f   :  { %v1685_v39 = vadd.f32 %v2315_v38, %v1684_v37  ;;  %v2319_v37 = vld [vmem:[%s3059_s2 + $0x11] ss:$0 sm:$0xff] }
 0xb91   :  { %v1694_v43 = vmax.f32 %v1685_v39, 0.0 }
 0xb96   :  { %v1686_v41 = vpop.f32.mrf.mxu0 }
 0xb97   :  { %v1687_v42 = vadd.f32 %v2315_v38, %v1686_v41 }
 0xb99   :  { %v1695_v44 = vmax.f32 %v1687_v42, 0.0 }
 0xb9b   :  { %v1702_v46 = vpack.c.bf16 %v1695_v44, %v1694_v43 }
 0xb9d   :  { %2199 = vmatmul.msk.bf16.vlgmr.msrb.gmra.mxu1 %vm464_vm10, %v1702_v46 }
 0xba6   :  { %v1689_v48 = vpop.f32.mrf.mxu0 }
 0xba7   :  { %v1690_v49 = vadd.f32 %v2315_v38, %v1689_v48 }
 0xba9   :  { %v1696_v53 = vmax.f32 %v1690_v49, 0.0 }
 0xbae   :  { %v1691_v50 = vpop.f32.mrf.mxu0 }
 0xbaf   :  { %v1692_v52 = vadd.f32 %v2315_v38, %v1691_v50  ;;  %v1853_v50 = vld [vmem:[%s3059_s2 + $0x12] sm:$0x1] }
 0xbb1   :  { %v1697_v54 = vmax.f32 %v1692_v52, 0.0  ;;  %v1864_v52 = vrot.slane %v1853_v50, 1 }
 0xbb3   :  { %v1703_v57 = vpack.c.bf16 %v1697_v54, %v1696_v53 }
 0xbb5   :  { %2200 = vmatmul.msk.bf16.gmra.mxu1 %vm464_vm10, %v1703_v57 }
 0xc1a   :  { %v1732_v59 = vpop.f32.mrf.mxu1 }
 0xc1b   :  { %v1733_v62 = vadd.f32 %v2316_v17, %v1732_v59 }
 0xc1d   :  { %v1742_v58 = vmax.f32 %v1733_v62, 0.0 }
 0xc1f   :  { %v1748_v4 = vadd.f32 %v1742_v58, %v1644_v19 }
 0xc21   :  { %v1752_v5 = vmax.f32 %v1748_v4, 0.0 }
 0xc22   :  { %v1734_v2 = vpop.f32.mrf.mxu1 }
 0xc23   :  { %v1735_v27 = vadd.f32 %v2316_v17, %v1734_v2 }
 0xc25   :  { %v1743_v26 = vmax.f32 %v1735_v27, 0.0 }
 0xc27   :  { %v1746_v63 = vadd.f32 %v1743_v26, %v1638_v47  ;;  %v1749_v25 = vadd.f32 %v1743_v26, %v1645_v20 }
 0xc29   :  { %v1753_v1 = vmax.f32 %v1749_v25, 0.0 }
 0xc2b   :  { %v1762_v7 = vpack.c.bf16 %v1753_v1, %v1752_v5 }
 0xc2d   :  { %2209 = vmatmul.msk.bf16.vlgmr.msrb.gmra.mxu3 %vm464_vm10, %v1762_v7 }
 0xc32   :  { %v1737_v56 = vpop.f32.mrf.mxu1 }
 0xc33   :  { %v1738_v10 = vadd.f32 %v2316_v17, %v1737_v56 }
 0xc35   :  { %v1744_v11 = vmax.f32 %v1738_v10, 0.0 }
 0xc37   :  { %v1750_v55 = vadd.f32 %v1744_v11, %v1646_v34  ;;  %v2318_v34 = vld [vmem:[%s3059_s2 + $0xf] ss:$0 sm:$0xff] }
 0xc39   :  { %v1754_v22 = vmax.f32 %v1750_v55, 0.0 }
 0xc3a   :  { %v1739_v51 = vpop.f32.mrf.mxu1 }
 0xc3b   :  { %v1740_v0 = vadd.f32 %v2316_v17, %v1739_v51 }
 0xc3d   :  { %v1745_v23 = vmax.f32 %v1740_v0, 0.0 }
 0xc3f   :  { %v1747_v13 = vadd.f32 %v1745_v23, %v1639_v8  ;;  %v1751_v15 = vadd.f32 %v1745_v23, %v1647_v60 }
 0xc41   :  { %v1755_v61 = vmax.f32 %v1751_v15, 0.0 }
 0xc43   :  { %v1763_v12 = vpack.c.bf16 %v1755_v61, %v1754_v22 }
 0xc45   :  { %2210 = vmatmul.msk.bf16.gmra.mxu3 %vm464_vm10, %v1763_v12 }
 0xcb0   :  { %v1792_v33 = vpop.f32.mrf.mxu3 }
 0xcb1   :  { %v1793_v47 = vadd.f32 %v2317_v14, %v1792_v33 }
 0xcb3   :  { %v1802_v20 = vmax.f32 %v1793_v47, 0.0 }
 0xcb8   :  { %v1794_v16 = vpop.f32.mrf.mxu3 }
 0xcb9   :  { %v1795_v19 = vadd.f32 %v2317_v14, %v1794_v16 }
 0xcbb   :  { %v1803_v21 = vmax.f32 %v1795_v19, 0.0 }
 0xcbd   :  { %v1810_v45 = vpack.c.bf16 %v1803_v21, %v1802_v20 }
 0xcbf   :  { %2219 = vmatmul.msk.bf16.vlgmr.msra.gmra.mxu2 %vm464_vm10, %v1810_v45 }
 0xcc8   :  { %v1797_v24 = vpop.f32.mrf.mxu3 }
 0xcc9   :  { %v1798_v28 = vadd.f32 %v2317_v14, %v1797_v24 }
 0xccb   :  { %v1804_v18 = vmax.f32 %v1798_v28, 0.0 }
 0xcd0   :  { %v1799_v29 = vpop.f32.mrf.mxu3 }
 0xcd1   :  { %v1800_v31 = vadd.f32 %v2317_v14, %v1799_v29 }
 0xcd3   :  { %v1805_v3 = vmax.f32 %v1800_v31, 0.0 }
 0xcd5   :  { %v1811_v8 = vpack.c.bf16 %v1805_v3, %v1804_v18 }
 0xcd7   :  { %2220 = vmatmul.msk.bf16.gmra.mxu2 %vm464_vm10, %v1811_v8 }
 0xd42   :  { %v1840_v32 = vpop.f32.mrf.mxu2 }
 0xd4a   :  { %v1841_v60 = vpop.f32.mrf.mxu2 }
 0xd4b   :  { %v1842_v35 = vadd.f32 %v2318_v34, %v1841_v60 }
 0xd4d   :  { %v1848_v36 = vmax.f32 %v1842_v35, 0.0 }
 0xd4f   :  { %v1850_v38 = vadd.f32 %v1848_v36, %v1746_v63 }
 0xd51   :  { %v1855_v39 = vmul.f32 %v2319_v37, %v1850_v38 }
 0xd53   :  { %v1857_v40 = vsel %vm464_vm10, %v1855_v39, 0.0 }
 0xd54   :  { %1858 = vadd.xlane.f32.xlu2 %v1857_v40 }
 0xd5a   :  { %v1844_v41 = vpop.f32.mrf.mxu2 }
 0xd62   :  { %v1845_v42 = vpop.f32.mrf.mxu2 }
 0xd63   :  { %v1846_v43 = vadd.f32 %v2318_v34, %v1845_v42 }
 0xd65   :  { %v1849_v44 = vmax.f32 %v1846_v43, 0.0 }
 0xd67   :  { %v1851_v46 = vadd.f32 %v1849_v44, %v1747_v13 }
 0xd69   :  { %v1856_v48 = vmul.f32 %v2319_v37, %v1851_v46 }
 0xd6b   :  { %v1860_v49 = vsel %vm464_vm10, %v1856_v48, 0.0 }
 0xd6c   :  { %1861 = vadd.xlane.f32.xlu0 %v1860_v49 }
 0xdc7   :  { %v1859_v53 = vpop.xlane.xlu2 %1858 }
 0xdc8   :  { %v1866_v54 = vadd.f32 %v1864_v52, %v1859_v53 }
 0xdca   :  { %1868 = vst.msk [vmem:[%s3060_s3 - $0x7] sm:$0x80] %vm1867_vm15, %v1866_v54 }
 0xddf   :  { %v1862_v57 = vpop.xlane.xlu0 %1861 }
 0xde0   :  { %v1869_v6 = vadd.f32 %v1864_v52, %v1862_v57 }
 0xde2   :  { %1870 = vst.msk [vmem:[%s3060_s3 - $0x6] sm:$0x80] %vm1867_vm15, %v1869_v6 }

</bundles_post_ra>
